<compile_context>
chip_gen: v7x
topology: tpu7x:2x2x1
jax: 0.10.0
libtpu: 0.0.40
codegen_flags: <defaults>
</compile_context>

<pallas_src>
import functools

import jax
import jax.numpy as jnp
from jax import lax
from jax.experimental import pallas as pl
from jax.experimental.pallas import tpu as pltpu

_LN_EPS = 1e-5
_INV_SQRT2 = 0.7071067811865476


def _layernorm_f32(x_f32, gamma, beta):
    mu = jnp.mean(x_f32, axis=-1, keepdims=True)
    var = jnp.mean((x_f32 - mu) ** 2, axis=-1, keepdims=True)
    return (x_f32 - mu) * lax.rsqrt(var + _LN_EPS) * gamma + beta


def _weight_spec(shape, index_map, single_buffer):
    # Grid-invariant weights: double buffering buys nothing (constant index
    # map) but doubles weight VMEM.  Single-buffer them when supported.
    if single_buffer:
        return pl.BlockSpec(shape, index_map, pipeline_mode=pl.Buffered(1))
    return pl.BlockSpec(shape, index_map)


# ---------------------------------------------------------------------------
# Kernel 1: LayerNorm1 + multi-head attention + residual
#           grid = (batch, query-tile)
# ---------------------------------------------------------------------------
def _ln_attn_kernel(x_ref, g_ref, bln_ref, wqkv_ref, wproj_ref, bproj_ref,
                    o_ref, ctx_ref, *, num_heads, tq, compute_dtype,
                    approx_recip):
    S = x_ref.shape[1]
    D = x_ref.shape[2]
    hd = D // num_heads
    scale = float(hd) ** -0.5

    qi = pl.program_id(1)
    q_start = pl.multiple_of(qi * tq, tq)

    gamma = g_ref[...]
    beta = bln_ref[...]
    wqkv = wqkv_ref[...]                                        # resident

    # Full-sequence LayerNorm -> K/V projection (keys/values see all tokens).
    x_full = x_ref[0].astype(jnp.float32)                       # (S, D)
    y_full = _layernorm_f32(x_full, gamma, beta).astype(compute_dtype)
    kv = jnp.dot(y_full, wqkv[:, D:],
                 preferred_element_type=jnp.float32)             # (S, 2D) f32
    kv = kv.astype(compute_dtype)

    # Query tile: LayerNorm + Q projection; fold 1/sqrt(hd) into the rows
    # (touches tq*D elements instead of the (tq,S) score matrix per head).
    x_q = x_ref[0, pl.ds(q_start, tq), :].astype(jnp.float32)    # (tq, D)
    y_q = (_layernorm_f32(x_q, gamma, beta) * scale).astype(compute_dtype)
    q = jnp.dot(y_q, wqkv[:, :D],
                preferred_element_type=jnp.float32).astype(compute_dtype)

    for h in range(num_heads):                                   # static unroll
        q_h = q[:, h * hd:(h + 1) * hd]                          # (tq, hd)
        k_h = kv[:, h * hd:(h + 1) * hd]                         # (S, hd)
        v_h = kv[:, D + h * hd:D + (h + 1) * hd]                 # (S, hd)

        s = lax.dot_general(q_h, k_h, (((1,), (1,)), ((), ())),
                            preferred_element_type=jnp.float32)  # (tq, S) f32
        s = s - jnp.max(s, axis=-1, keepdims=True)
        p = jnp.exp(s)
        inv = pl.reciprocal(jnp.sum(p, axis=-1, keepdims=True),
                            approx=approx_recip)
        p = (p * inv).astype(compute_dtype)
        o_h = jnp.dot(p, v_h, preferred_element_type=jnp.float32)  # (tq, hd)
        ctx_ref[:, h * hd:(h + 1) * hd] = o_h                    # f32 scratch

    # One K=D projection matmul (full MXU depth) instead of per-head K=hd.
    ctx = ctx_ref[...].astype(compute_dtype)
    attn = jnp.dot(ctx, wproj_ref[...],
                   preferred_element_type=jnp.float32) + bproj_ref[...]
    o_ref[0] = (x_q + attn).astype(o_ref.dtype)                  # residual


# ---------------------------------------------------------------------------
# Kernel 2: LayerNorm2 + fc1 -> GELU -> fc2 + residual (tm tokens per step)
# ---------------------------------------------------------------------------
def _ln_mlp_kernel(x_ref, g_ref, bln_ref, w1_ref, b1_ref, w2_ref, b2_ref,
                   o_ref):
    x_f32 = x_ref[...].astype(jnp.float32)            # (tm, D)
    y = _layernorm_f32(x_f32, g_ref[...], bln_ref[...])
    y = y.astype(w1_ref.dtype)                        # matmul in weight dtype

    h = jnp.dot(y, w1_ref[...],
                preferred_element_type=jnp.float32) + b1_ref[...]
    # Exact erf GELU (matches torch.nn.GELU() default).  If the model
    # tolerates it, jax.nn.gelu(approximate=True) moves this to the EUP slot.
    h = 0.5 * h * (1.0 + lax.erf(h * _INV_SQRT2))
    h = h.astype(w2_ref.dtype)

    o = jnp.dot(h, w2_ref[...],
                preferred_element_type=jnp.float32) + b2_ref[...]
    o_ref[...] = (x_f32 + o).astype(o_ref.dtype)      # residual


# ---------------------------------------------------------------------------
# Wrappers
# ---------------------------------------------------------------------------
def _pick_tq(S):
    # Split queries only when it creates useful extra grid steps with aligned
    # tiles; otherwise keep the whole sequence per step.
    for cand in (512, 256, 128):
        if S > cand and S % cand == 0:
            return cand
    return S


def _attention_block(x, ln_g, ln_b, wqkv, wproj, bproj, *, num_heads,
                     compute_dtype=None, tq=None):
    B, S, D = x.shape
    assert D % num_heads == 0, "dim must be divisible by num_heads"
    hd = D // num_heads

    if compute_dtype is None:
        compute_dtype = wqkv.dtype        # bf16 weights -> native bf16 MXU ops
    compute_dtype = jnp.dtype(compute_dtype)
    # Keep exact division in the f32-exact path; EUP approx in the bf16 path.
    approx_recip = compute_dtype != jnp.dtype(jnp.float32)

    if tq is None or tq <= 0 or tq > S or S % tq != 0 or (tq != S and tq % 8):
        tq = _pick_tq(S)
    n_q = S // tq

    kernel = functools.partial(_ln_attn_kernel, num_heads=num_heads, tq=tq,
                               compute_dtype=compute_dtype,
                               approx_recip=approx_recip)

    xb = x.dtype.itemsize
    wb = wqkv.dtype.itemsize
    cb = compute_dtype.itemsize
    # Per-step VMEM footprint (generous): x / out blocks (double buffered),
    # resident weights (<= 2 buffers), scratch, f32 intermediates.
    est = (2 * S * D * xb + 2 * tq * D * xb
           + 2 * (3 * D * D + D * D) * wb
           + 8 * 3 * D
           + tq * D * 4
           + (S * D + 2 * S * D + tq * D) * (4 + cb)
           + 3 * tq * S * 4)
    vmem_limit = int(min(56 << 20, max(32 << 20, est + (8 << 20))))

    flops = int(B * n_q * (2 * S * D * 2 * D + 2 * tq * D * D)
                + B * (4 * num_heads * S * S * hd + 2 * S * D * D))
    bytes_accessed = int(2 * x.size * xb + (wqkv.size + wproj.size) * wb
                         + (bproj.size + ln_g.size + ln_b.size) * 4)

    def build(single_buffer):
        grid_spec = pltpu.PrefetchScalarGridSpec(
            num_scalar_prefetch=0,
            grid=(B, n_q),
            in_specs=[
                pl.BlockSpec((1, S, D), lambda b, q: (b, 0, 0)),   # x (full seq)
                pl.BlockSpec((1, D), lambda b, q: (0, 0)),         # ln1 gamma
                pl.BlockSpec((1, D), lambda b, q: (0, 0)),         # ln1 beta
                _weight_spec((D, 3 * D), lambda b, q: (0, 0), single_buffer),
                _weight_spec((D, D), lambda b, q: (0, 0), single_buffer),
                pl.BlockSpec((1, D), lambda b, q: (0, 0)),         # bproj
            ],
            out_specs=pl.BlockSpec((1, tq, D), lambda b, q: (b, q, 0)),
            scratch_shapes=[pltpu.VMEM((tq, D), jnp.float32)],     # ctx
        )
        return pl.pallas_call(
            kernel,
            out_shape=jax.ShapeDtypeStruct((B, S, D), x.dtype),
            grid_spec=grid_spec,
            compiler_params=pltpu.CompilerParams(
                dimension_semantics=("parallel", "parallel"),
                vmem_limit_bytes=vmem_limit),
            cost_estimate=pl.CostEstimate(
                flops=flops,
                transcendentals=int(B * num_heads * S * S),
                bytes_accessed=bytes_accessed),
        )(x, ln_g.reshape(1, D), ln_b.reshape(1, D), wqkv, wproj,
          bproj.reshape(1, D))

    try:
        return build(True)
    except Exception:       # pipeline_mode / pl.Buffered not supported here
        return build(False)


def _mlp_block(x, ln_g, ln_b, w1, b1, w2, b2, *, tm=256):
    B, S, D = x.shape
    H = w1.shape[1]
    M = B * S

    # Large token tile for a long MXU M-stream.  No jnp.pad: a ragged last
    # block (rows are independent) is handled by Pallas (OOB writes dropped).
    if M <= tm:
        tm = M                       # single tile; block dim == full array dim
    else:
        tm = max(8, (tm // 8) * 8)   # sublane-aligned tile
    grid = (pl.cdiv(M, tm),)

    x2d = x.reshape(M, D)            # free reshape, no HBM round trip

    xb = x.dtype.itemsize
    wb = w1.dtype.itemsize
    est = (2 * 2 * tm * D * xb                    # x + out tiles, 2 buffers
           + 2 * (D * H + H * D) * wb             # w1/w2 (<= 2 buffers)
           + 4 * (3 * D + H)                      # LN params + biases
           + tm * H * (4 + wb) + 2 * tm * D * 4)  # f32 intermediates
    # Cap below the smallest physical VMEM (v7x: 64 MiB / TC) with headroom.
    vmem_limit = int(min(56 << 20, max(32 << 20, est + (8 << 20))))

    flops = int(4 * M * D * H + 10 * M * D)
    bytes_accessed = int(2 * M * D * xb + (D * H + H * D) * wb
                         + 4 * (3 * D + H))

    def build(single_buffer):
        grid_spec = pltpu.PrefetchScalarGridSpec(
            num_scalar_prefetch=0,
            grid=grid,
            in_specs=[
                pl.BlockSpec((tm, D), lambda i: (i, 0)),   # x1 tile (residual)
                pl.BlockSpec((1, D), lambda i: (0, 0)),    # ln2 gamma
                pl.BlockSpec((1, D), lambda i: (0, 0)),    # ln2 beta
                _weight_spec((D, H), lambda i: (0, 0), single_buffer),
                pl.BlockSpec((1, H), lambda i: (0, 0)),    # b1
                _weight_spec((H, D), lambda i: (0, 0), single_buffer),
                pl.BlockSpec((1, D), lambda i: (0, 0)),    # b2
            ],
            out_specs=pl.BlockSpec((tm, D), lambda i: (i, 0)),
        )
        return pl.pallas_call(
            _ln_mlp_kernel,
            out_shape=jax.ShapeDtypeStruct((M, D), x.dtype),
            grid_spec=grid_spec,
            compiler_params=pltpu.CompilerParams(
                dimension_semantics=("parallel",),
                vmem_limit_bytes=vmem_limit),
            cost_estimate=pl.CostEstimate(
                flops=flops, transcendentals=int(M * H),
                bytes_accessed=bytes_accessed),
        )(x2d, ln_g.reshape(1, D), ln_b.reshape(1, D), w1, b1.reshape(1, H),
          w2, b2.reshape(1, D))

    try:
        out2d = build(True)
    except Exception:       # pipeline_mode / pl.Buffered not supported here
        out2d = build(False)
    return out2d.reshape(B, S, D)


def encoder_block_forward(x, ln1_g, ln1_b, wqkv, wproj, bproj,
                          ln2_g, ln2_b, w1, b1, w2, b2,
                          *, num_heads=8, tm=256, tq=None,
                          attn_compute_dtype=None):
    """x: (B, S, D). Weight layout: y @ W (W is (in, out)).

    Pass bf16 weights/activations (or set attn_compute_dtype=jnp.bfloat16) to
    run every matmul as native bf16 MXU ops with f32 accumulation.
    On v6e, sweeping tm up to 512 is worthwhile (128 MiB VMEM).
    """
    x1 = _attention_block(x, ln1_g, ln1_b, wqkv, wproj, bproj,
                          num_heads=num_heads, tq=tq,
                          compute_dtype=attn_compute_dtype)
    return _mlp_block(x1, ln2_g, ln2_b, w1, b1, w2, b2, tm=tm)


# ---------------------------------------------------------------------------
# Pure-JAX reference
# ---------------------------------------------------------------------------
def encoder_block_reference(x, ln1_g, ln1_b, wqkv, wproj, bproj,
                            ln2_g, ln2_b, w1, b1, w2, b2, *, num_heads=8):
    prec = lax.Precision.HIGHEST

    def ln(v, g, b):
        mu = jnp.mean(v, axis=-1, keepdims=True)
        var = jnp.mean((v - mu) ** 2, axis=-1, keepdims=True)
        return (v - mu) / jnp.sqrt(var + _LN_EPS) * g + b

    B, S, D = x.shape
    hd = D // num_heads

    y = ln(x, ln1_g, ln1_b)
    qkv = jnp.einsum("bsd,de->bse", y, wqkv, precision=prec)
    q = qkv[..., 0 * D:1 * D].reshape(B, S, num_heads, hd)
    k = qkv[..., 1 * D:2 * D].reshape(B, S, num_heads, hd)
    v = qkv[..., 2 * D:3 * D].reshape(B, S, num_heads, hd)
    attn = jnp.einsum("bqhd,bkhd->bhqk", q, k, precision=prec) * (hd ** -0.5)
    attn = jax.nn.softmax(attn, axis=-1)
    ctx = jnp.einsum("bhqk,bkhd->bqhd", attn, v, precision=prec).reshape(B, S, D)
    x1 = x + jnp.einsum("bsd,de->bse", ctx, wproj, precision=prec) + bproj

    y2 = ln(x1, ln2_g, ln2_b)
    h = jnp.einsum("bsd,dh->bsh", y2, w1, precision=prec) + b1
    h = 0.5 * h * (1.0 + lax.erf(h * _INV_SQRT2))
    return x1 + jnp.einsum("bsh,hd->bsd", h, w2, precision=prec) + b2


if __name__ == "__main__":
    B, S, D = 2, 8, 32
    num_heads = 8
    H = 4 * D

    key = jax.random.PRNGKey(0)
    ks = jax.random.split(key, 12)

    x = jax.random.normal(ks[0], (B, S, D), jnp.float32)
    ln1_g = 1.0 + 0.1 * jax.random.normal(ks[1], (D,), jnp.float32)
    ln1_b = 0.1 * jax.random.normal(ks[2], (D,), jnp.float32)
    wqkv = jax.random.normal(ks[3], (D, 3 * D), jnp.float32) / jnp.sqrt(D)
    wproj = jax.random.normal(ks[4], (D, D), jnp.float32) / jnp.sqrt(D)
    bproj = 0.1 * jax.random.normal(ks[5], (D,), jnp.float32)
    ln2_g = 1.0 + 0.1 * jax.random.normal(ks[6], (D,), jnp.float32)
    ln2_b = 0.1 * jax.random.normal(ks[7], (D,), jnp.float32)
    w1 = jax.random.normal(ks[8], (D, H), jnp.float32) / jnp.sqrt(D)
    b1 = 0.1 * jax.random.normal(ks[9], (H,), jnp.float32)
    w2 = jax.random.normal(ks[10], (H, D), jnp.float32) / jnp.sqrt(H)
    b2 = 0.1 * jax.random.normal(ks[11], (D,), jnp.float32)

    args = (x, ln1_g, ln1_b, wqkv, wproj, bproj, ln2_g, ln2_b, w1, b1, w2, b2)

    # f32 weights -> matmuls stay f32 (exact vs reference, tight tolerance).
    out = encoder_block_forward(*args, num_heads=num_heads, tm=256)
    jax.block_until_ready(out)
    ref = encoder_block_reference(*args, num_heads=num_heads)
    assert out.shape == (B, S, D)
    assert bool(jnp.all(jnp.isfinite(out)))
    max_err = float(jnp.max(jnp.abs(out - ref)))
    assert jnp.allclose(out, ref, atol=1e-3, rtol=1e-3), \
        f"f32 max abs err {max_err}"

    # Caller-side bf16 cast: every matmul runs as native bf16 MXU ops with f32
    # accumulation (the fast path on v5e/v6e/v7x); loose tolerance vs f32 ref.
    args_bf16 = tuple(a.astype(jnp.bfloat16) for a in args)
    out_bf16 = encoder_block_forward(*args_bf16, num_heads=num_heads, tm=256)
    jax.block_until_ready(out_bf16)
    out_bf16_f32 = out_bf16.astype(jnp.float32)
    assert out_bf16.shape == (B, S, D)
    assert bool(jnp.all(jnp.isfinite(out_bf16_f32)))
    max_err_bf16 = float(jnp.max(jnp.abs(out_bf16_f32 - ref)))
    assert jnp.allclose(out_bf16_f32, ref, atol=1e-1, rtol=1e-1), \
        f"bf16 max abs err {max_err_bf16}"

    print("KERNEL_OK")
</pallas_src>

<mosaic_0001>
module attributes {stable_mosaic.version = 11 : i64} {
  func.func @_ln_attn_kernel(%arg0: i32, %arg1: i32, %arg2: memref<1x8x32xf32, #tpu.memory_space<vmem>>, %arg3: memref<1x32xf32, #tpu.memory_space<vmem>>, %arg4: memref<1x32xf32, #tpu.memory_space<vmem>>, %arg5: memref<32x96xf32, #tpu.memory_space<vmem>>, %arg6: memref<32x32xf32, #tpu.memory_space<vmem>>, %arg7: memref<1x32xf32, #tpu.memory_space<vmem>>, %arg8: memref<1x8x32xf32, #tpu.memory_space<vmem>>, %arg9: memref<8x32xf32, #tpu.memory_space<vmem>>) attributes {dimension_semantics = [#tpu.dimension_semantics<parallel>, #tpu.dimension_semantics<parallel>], iteration_bounds = array<i64: 2, 1>, scalar_prefetch = 0 : i64, scratch_operands = 1 : i64, tpu.core_type = #tpu.core_type<tc>, window_params = [{transform_indices = @transform_0, window_bounds = array<i64: 1, 8, 32>}, {pipeline_mode = #tpu.pipeline_mode<synchronous>, transform_indices = @transform_1, window_bounds = array<i64: 1, 32>}, {pipeline_mode = #tpu.pipeline_mode<synchronous>, transform_indices = @transform_2, window_bounds = array<i64: 1, 32>}, {pipeline_mode = #tpu.pipeline_mode<synchronous>, transform_indices = @transform_3, window_bounds = array<i64: 32, 96>}, {pipeline_mode = #tpu.pipeline_mode<synchronous>, transform_indices = @transform_4, window_bounds = array<i64: 32, 32>}, {pipeline_mode = #tpu.pipeline_mode<synchronous>, transform_indices = @transform_5, window_bounds = array<i64: 1, 32>}, {transform_indices = @transform_6, window_bounds = array<i64: 1, 8, 32>}]} {
    %c8_i32 = arith.constant 8 : i32
    %0 = arith.muli %arg1, %c8_i32 : i32
    %1 = tpu.assume_multiple %0, 8 : i32
    %c0 = arith.constant 0 : index
    %c0_0 = arith.constant 0 : index
    %2 = vector.load %arg3[%c0, %c0_0] : memref<1x32xf32, #tpu.memory_space<vmem>>, vector<1x32xf32>
    %c0_1 = arith.constant 0 : index
    %c0_2 = arith.constant 0 : index
    %3 = vector.load %arg4[%c0_1, %c0_2] : memref<1x32xf32, #tpu.memory_space<vmem>>, vector<1x32xf32>
    %c0_3 = arith.constant 0 : index
    %c0_4 = arith.constant 0 : index
    %4 = vector.load %arg5[%c0_3, %c0_4] : memref<32x96xf32, #tpu.memory_space<vmem>>, vector<32x96xf32>
    %c0_5 = arith.constant 0 : index
    %c0_6 = arith.constant 0 : index
    %c0_7 = arith.constant 0 : index
    %5 = vector.load %arg2[%c0_5, %c0_6, %c0_7] : memref<1x8x32xf32, #tpu.memory_space<vmem>>, vector<1x8x32xf32>
    %6 = vector.shape_cast %5 : vector<1x8x32xf32> to vector<8x32xf32>
    %cst = arith.constant dense<0.000000e+00> : vector<8xf32>
    %7 = vector.multi_reduction <add>, %6, %cst [1] : vector<8x32xf32> to vector<8xf32>
    %8 = vector.shape_cast %7 : vector<8xf32> to vector<8x1xf32>
    %cst_8 = arith.constant 3.200000e+01 : f32
    %9 = vector.broadcast %cst_8 : f32 to vector<8x1xf32>
    %10 = arith.divf %8, %9 : vector<8x1xf32>
    %11 = vector.broadcast %10 : vector<8x1xf32> to vector<8x32xf32>
    %12 = arith.subf %6, %11 : vector<8x32xf32>
    %13 = arith.mulf %12, %12 : vector<8x32xf32>
    %cst_9 = arith.constant dense<0.000000e+00> : vector<8xf32>
    %14 = vector.multi_reduction <add>, %13, %cst_9 [1] : vector<8x32xf32> to vector<8xf32>
    %15 = vector.shape_cast %14 : vector<8xf32> to vector<8x1xf32>
    %cst_10 = arith.constant 3.200000e+01 : f32
    %16 = vector.broadcast %cst_10 : f32 to vector<8x1xf32>
    %17 = arith.divf %15, %16 : vector<8x1xf32>
    %18 = vector.broadcast %10 : vector<8x1xf32> to vector<8x32xf32>
    %19 = arith.subf %6, %18 : vector<8x32xf32>
    %cst_11 = arith.constant 9.99999974E-6 : f32
    %20 = vector.broadcast %cst_11 : f32 to vector<8x1xf32>
    %21 = arith.addf %17, %20 : vector<8x1xf32>
    %22 = math.rsqrt %21 : vector<8x1xf32>
    %23 = vector.broadcast %22 : vector<8x1xf32> to vector<8x32xf32>
    %24 = arith.mulf %19, %23 : vector<8x32xf32>
    %25 = vector.broadcast %2 : vector<1x32xf32> to vector<8x32xf32>
    %26 = arith.mulf %24, %25 : vector<8x32xf32>
    %27 = vector.broadcast %3 : vector<1x32xf32> to vector<8x32xf32>
    %28 = arith.addf %26, %27 : vector<8x32xf32>
    %29 = vector.extract_strided_slice %4 {offsets = [0, 32], sizes = [32, 64], strides = [1, 1]} : vector<32x96xf32> to vector<32x64xf32>
    %cst_12 = arith.constant dense<0.000000e+00> : vector<8x64xf32>
    %30 = tpu.matmul %28, %29, %cst_12 {dimension_numbers = #tpu.dot_dimension_numbers<[1], [0], [0], [1], [0, 0, 1, 1], [], []>} : vector<8x32xf32>, vector<32x64xf32>, vector<8x64xf32> -> vector<8x64xf32>
    %c0_13 = arith.constant 0 : index
    %31 = arith.index_cast %1 : i32 to index
    %c0_14 = arith.constant 0 : index
    %32 = vector.load %arg2[%c0_13, %31, %c0_14] : memref<1x8x32xf32, #tpu.memory_space<vmem>>, vector<1x8x32xf32>
    %33 = vector.shape_cast %32 : vector<1x8x32xf32> to vector<8x32xf32>
    %cst_15 = arith.constant dense<0.000000e+00> : vector<8xf32>
    %34 = vector.multi_reduction <add>, %33, %cst_15 [1] : vector<8x32xf32> to vector<8xf32>
    %35 = vector.shape_cast %34 : vector<8xf32> to vector<8x1xf32>
    %cst_16 = arith.constant 3.200000e+01 : f32
    %36 = vector.broadcast %cst_16 : f32 to vector<8x1xf32>
    %37 = arith.divf %35, %36 : vector<8x1xf32>
    %38 = vector.broadcast %37 : vector<8x1xf32> to vector<8x32xf32>
    %39 = arith.subf %33, %38 : vector<8x32xf32>
    %40 = arith.mulf %39, %39 : vector<8x32xf32>
    %cst_17 = arith.constant dense<0.000000e+00> : vector<8xf32>
    %41 = vector.multi_reduction <add>, %40, %cst_17 [1] : vector<8x32xf32> to vector<8xf32>
    %42 = vector.shape_cast %41 : vector<8xf32> to vector<8x1xf32>
    %cst_18 = arith.constant 3.200000e+01 : f32
    %43 = vector.broadcast %cst_18 : f32 to vector<8x1xf32>
    %44 = arith.divf %42, %43 : vector<8x1xf32>
    %45 = vector.broadcast %37 : vector<8x1xf32> to vector<8x32xf32>
    %46 = arith.subf %33, %45 : vector<8x32xf32>
    %cst_19 = arith.constant 9.99999974E-6 : f32
    %47 = vector.broadcast %cst_19 : f32 to vector<8x1xf32>
    %48 = arith.addf %44, %47 : vector<8x1xf32>
    %49 = math.rsqrt %48 : vector<8x1xf32>
    %50 = vector.broadcast %49 : vector<8x1xf32> to vector<8x32xf32>
    %51 = arith.mulf %46, %50 : vector<8x32xf32>
    %52 = vector.broadcast %2 : vector<1x32xf32> to vector<8x32xf32>
    %53 = arith.mulf %51, %52 : vector<8x32xf32>
    %54 = vector.broadcast %3 : vector<1x32xf32> to vector<8x32xf32>
    %55 = arith.addf %53, %54 : vector<8x32xf32>
    %cst_20 = arith.constant 5.000000e-01 : f32
    %56 = vector.broadcast %cst_20 : f32 to vector<8x32xf32>
    %57 = arith.mulf %55, %56 : vector<8x32xf32>
    %58 = vector.extract_strided_slice %4 {offsets = [0, 0], sizes = [32, 32], strides = [1, 1]} : vector<32x96xf32> to vector<32x32xf32>
    %cst_21 = arith.constant dense<0.000000e+00> : vector<8x32xf32>
    %59 = tpu.matmul %57, %58, %cst_21 {dimension_numbers = #tpu.dot_dimension_numbers<[1], [0], [0], [1], [0, 0, 1, 1], [], []>} : vector<8x32xf32>, vector<32x32xf32>, vector<8x32xf32> -> vector<8x32xf32>
    %60 = vector.extract_strided_slice %59 {offsets = [0, 0], sizes = [8, 4], strides = [1, 1]} : vector<8x32xf32> to vector<8x4xf32>
    %61 = vector.extract_strided_slice %30 {offsets = [0, 0], sizes = [8, 4], strides = [1, 1]} : vector<8x64xf32> to vector<8x4xf32>
    %62 = vector.extract_strided_slice %30 {offsets = [0, 32], sizes = [8, 4], strides = [1, 1]} : vector<8x64xf32> to vector<8x4xf32>
    %cst_22 = arith.constant dense<0.000000e+00> : vector<8x8xf32>
    %63 = tpu.matmul %60, %61, %cst_22 {dimension_numbers = #tpu.dot_dimension_numbers<[1], [1], [0], [0], [0, 0, 1, 0], [], []>} : vector<8x4xf32>, vector<8x4xf32>, vector<8x8xf32> -> vector<8x8xf32>
    %cst_23 = arith.constant dense<0xFF800000> : vector<8xf32>
    %64 = vector.multi_reduction <maximumf>, %63, %cst_23 [1] : vector<8x8xf32> to vector<8xf32>
    %65 = vector.shape_cast %64 : vector<8xf32> to vector<8x1xf32>
    %66 = vector.broadcast %65 : vector<8x1xf32> to vector<8x8xf32>
    %67 = arith.subf %63, %66 : vector<8x8xf32>
    %68 = math.exp %67 : vector<8x8xf32>
    %cst_24 = arith.constant dense<0.000000e+00> : vector<8xf32>
    %69 = vector.multi_reduction <add>, %68, %cst_24 [1] : vector<8x8xf32> to vector<8xf32>
    %70 = vector.shape_cast %69 : vector<8xf32> to vector<8x1xf32>
    %71 = tpu.reciprocal %70 : vector<8x1xf32> -> vector<8x1xf32>
    %72 = vector.broadcast %71 : vector<8x1xf32> to vector<8x8xf32>
    %73 = arith.mulf %68, %72 : vector<8x8xf32>
    %cst_25 = arith.constant dense<0.000000e+00> : vector<8x4xf32>
    %74 = tpu.matmul %73, %62, %cst_25 {dimension_numbers = #tpu.dot_dimension_numbers<[1], [0], [0], [1], [0, 0, 1, 1], [], []>} : vector<8x8xf32>, vector<8x4xf32>, vector<8x4xf32> -> vector<8x4xf32>
    %c0_26 = arith.constant 0 : index
    %c0_27 = arith.constant 0 : index
    %75 = vector.load %arg9[%c0_26, %c0_27] : memref<8x32xf32, #tpu.memory_space<vmem>>, vector<8x4xf32>
    tpu.vector_store %arg9[%c0_26, %c0_27], %74 {strides = array<i32>} : memref<8x32xf32, #tpu.memory_space<vmem>>, vector<8x4xf32>,
    %76 = vector.extract_strided_slice %59 {offsets = [0, 4], sizes = [8, 4], strides = [1, 1]} : vector<8x32xf32> to vector<8x4xf32>
    %77 = vector.extract_strided_slice %30 {offsets = [0, 4], sizes = [8, 4], strides = [1, 1]} : vector<8x64xf32> to vector<8x4xf32>
    %78 = vector.extract_strided_slice %30 {offsets = [0, 36], sizes = [8, 4], strides = [1, 1]} : vector<8x64xf32> to vector<8x4xf32>
    %cst_28 = arith.constant dense<0.000000e+00> : vector<8x8xf32>
    %79 = tpu.matmul %76, %77, %cst_28 {dimension_numbers = #tpu.dot_dimension_numbers<[1], [1], [0], [0], [0, 0, 1, 0], [], []>} : vector<8x4xf32>, vector<8x4xf32>, vector<8x8xf32> -> vector<8x8xf32>
    %cst_29 = arith.constant dense<0xFF800000> : vector<8xf32>
    %80 = vector.multi_reduction <maximumf>, %79, %cst_29 [1] : vector<8x8xf32> to vector<8xf32>
    %81 = vector.shape_cast %80 : vector<8xf32> to vector<8x1xf32>
    %82 = vector.broadcast %81 : vector<8x1xf32> to vector<8x8xf32>
    %83 = arith.subf %79, %82 : vector<8x8xf32>
    %84 = math.exp %83 : vector<8x8xf32>
    %cst_30 = arith.constant dense<0.000000e+00> : vector<8xf32>
    %85 = vector.multi_reduction <add>, %84, %cst_30 [1] : vector<8x8xf32> to vector<8xf32>
    %86 = vector.shape_cast %85 : vector<8xf32> to vector<8x1xf32>
    %87 = tpu.reciprocal %86 : vector<8x1xf32> -> vector<8x1xf32>
    %88 = vector.broadcast %87 : vector<8x1xf32> to vector<8x8xf32>
    %89 = arith.mulf %84, %88 : vector<8x8xf32>
    %cst_31 = arith.constant dense<0.000000e+00> : vector<8x4xf32>
    %90 = tpu.matmul %89, %78, %cst_31 {dimension_numbers = #tpu.dot_dimension_numbers<[1], [0], [0], [1], [0, 0, 1, 1], [], []>} : vector<8x8xf32>, vector<8x4xf32>, vector<8x4xf32> -> vector<8x4xf32>
    %c0_32 = arith.constant 0 : index
    %c4 = arith.constant 4 : index
    %91 = vector.load %arg9[%c0_32, %c4] : memref<8x32xf32, #tpu.memory_space<vmem>>, vector<8x4xf32>
    tpu.vector_store %arg9[%c0_32, %c4], %90 {strides = array<i32>} : memref<8x32xf32, #tpu.memory_space<vmem>>, vector<8x4xf32>,
    %92 = vector.extract_strided_slice %59 {offsets = [0, 8], sizes = [8, 4], strides = [1, 1]} : vector<8x32xf32> to vector<8x4xf32>
    %93 = vector.extract_strided_slice %30 {offsets = [0, 8], sizes = [8, 4], strides = [1, 1]} : vector<8x64xf32> to vector<8x4xf32>
    %94 = vector.extract_strided_slice %30 {offsets = [0, 40], sizes = [8, 4], strides = [1, 1]} : vector<8x64xf32> to vector<8x4xf32>
    %cst_33 = arith.constant dense<0.000000e+00> : vector<8x8xf32>
    %95 = tpu.matmul %92, %93, %cst_33 {dimension_numbers = #tpu.dot_dimension_numbers<[1], [1], [0], [0], [0, 0, 1, 0], [], []>} : vector<8x4xf32>, vector<8x4xf32>, vector<8x8xf32> -> vector<8x8xf32>
    %cst_34 = arith.constant dense<0xFF800000> : vector<8xf32>
    %96 = vector.multi_reduction <maximumf>, %95, %cst_34 [1] : vector<8x8xf32> to vector<8xf32>
    %97 = vector.shape_cast %96 : vector<8xf32> to vector<8x1xf32>
    %98 = vector.broadcast %97 : vector<8x1xf32> to vector<8x8xf32>
    %99 = arith.subf %95, %98 : vector<8x8xf32>
    %100 = math.exp %99 : vector<8x8xf32>
    %cst_35 = arith.constant dense<0.000000e+00> : vector<8xf32>
    %101 = vector.multi_reduction <add>, %100, %cst_35 [1] : vector<8x8xf32> to vector<8xf32>
    %102 = vector.shape_cast %101 : vector<8xf32> to vector<8x1xf32>
    %103 = tpu.reciprocal %102 : vector<8x1xf32> -> vector<8x1xf32>
    %104 = vector.broadcast %103 : vector<8x1xf32> to vector<8x8xf32>
    %105 = arith.mulf %100, %104 : vector<8x8xf32>
    %cst_36 = arith.constant dense<0.000000e+00> : vector<8x4xf32>
    %106 = tpu.matmul %105, %94, %cst_36 {dimension_numbers = #tpu.dot_dimension_numbers<[1], [0], [0], [1], [0, 0, 1, 1], [], []>} : vector<8x8xf32>, vector<8x4xf32>, vector<8x4xf32> -> vector<8x4xf32>
    %c0_37 = arith.constant 0 : index
    %c8 = arith.constant 8 : index
    %107 = vector.load %arg9[%c0_37, %c8] : memref<8x32xf32, #tpu.memory_space<vmem>>, vector<8x4xf32>
    tpu.vector_store %arg9[%c0_37, %c8], %106 {strides = array<i32>} : memref<8x32xf32, #tpu.memory_space<vmem>>, vector<8x4xf32>,
    %108 = vector.extract_strided_slice %59 {offsets = [0, 12], sizes = [8, 4], strides = [1, 1]} : vector<8x32xf32> to vector<8x4xf32>
    %109 = vector.extract_strided_slice %30 {offsets = [0, 12], sizes = [8, 4], strides = [1, 1]} : vector<8x64xf32> to vector<8x4xf32>
    %110 = vector.extract_strided_slice %30 {offsets = [0, 44], sizes = [8, 4], strides = [1, 1]} : vector<8x64xf32> to vector<8x4xf32>
    %cst_38 = arith.constant dense<0.000000e+00> : vector<8x8xf32>
    %111 = tpu.matmul %108, %109, %cst_38 {dimension_numbers = #tpu.dot_dimension_numbers<[1], [1], [0], [0], [0, 0, 1, 0], [], []>} : vector<8x4xf32>, vector<8x4xf32>, vector<8x8xf32> -> vector<8x8xf32>
    %cst_39 = arith.constant dense<0xFF800000> : vector<8xf32>
    %112 = vector.multi_reduction <maximumf>, %111, %cst_39 [1] : vector<8x8xf32> to vector<8xf32>
    %113 = vector.shape_cast %112 : vector<8xf32> to vector<8x1xf32>
    %114 = vector.broadcast %113 : vector<8x1xf32> to vector<8x8xf32>
    %115 = arith.subf %111, %114 : vector<8x8xf32>
    %116 = math.exp %115 : vector<8x8xf32>
    %cst_40 = arith.constant dense<0.000000e+00> : vector<8xf32>
    %117 = vector.multi_reduction <add>, %116, %cst_40 [1] : vector<8x8xf32> to vector<8xf32>
    %118 = vector.shape_cast %117 : vector<8xf32> to vector<8x1xf32>
    %119 = tpu.reciprocal %118 : vector<8x1xf32> -> vector<8x1xf32>
    %120 = vector.broadcast %119 : vector<8x1xf32> to vector<8x8xf32>
    %121 = arith.mulf %116, %120 : vector<8x8xf32>
    %cst_41 = arith.constant dense<0.000000e+00> : vector<8x4xf32>
    %122 = tpu.matmul %121, %110, %cst_41 {dimension_numbers = #tpu.dot_dimension_numbers<[1], [0], [0], [1], [0, 0, 1, 1], [], []>} : vector<8x8xf32>, vector<8x4xf32>, vector<8x4xf32> -> vector<8x4xf32>
    %c0_42 = arith.constant 0 : index
    %c12 = arith.constant 12 : index
    %123 = vector.load %arg9[%c0_42, %c12] : memref<8x32xf32, #tpu.memory_space<vmem>>, vector<8x4xf32>
    tpu.vector_store %arg9[%c0_42, %c12], %122 {strides = array<i32>} : memref<8x32xf32, #tpu.memory_space<vmem>>, vector<8x4xf32>,
    %124 = vector.extract_strided_slice %59 {offsets = [0, 16], sizes = [8, 4], strides = [1, 1]} : vector<8x32xf32> to vector<8x4xf32>
    %125 = vector.extract_strided_slice %30 {offsets = [0, 16], sizes = [8, 4], strides = [1, 1]} : vector<8x64xf32> to vector<8x4xf32>
    %126 = vector.extract_strided_slice %30 {offsets = [0, 48], sizes = [8, 4], strides = [1, 1]} : vector<8x64xf32> to vector<8x4xf32>
    %cst_43 = arith.constant dense<0.000000e+00> : vector<8x8xf32>
    %127 = tpu.matmul %124, %125, %cst_43 {dimension_numbers = #tpu.dot_dimension_numbers<[1], [1], [0], [0], [0, 0, 1, 0], [], []>} : vector<8x4xf32>, vector<8x4xf32>, vector<8x8xf32> -> vector<8x8xf32>
    %cst_44 = arith.constant dense<0xFF800000> : vector<8xf32>
    %128 = vector.multi_reduction <maximumf>, %127, %cst_44 [1] : vector<8x8xf32> to vector<8xf32>
    %129 = vector.shape_cast %128 : vector<8xf32> to vector<8x1xf32>
    %130 = vector.broadcast %129 : vector<8x1xf32> to vector<8x8xf32>
    %131 = arith.subf %127, %130 : vector<8x8xf32>
    %132 = math.exp %131 : vector<8x8xf32>
    %cst_45 = arith.constant dense<0.000000e+00> : vector<8xf32>
    %133 = vector.multi_reduction <add>, %132, %cst_45 [1] : vector<8x8xf32> to vector<8xf32>
    %134 = vector.shape_cast %133 : vector<8xf32> to vector<8x1xf32>
    %135 = tpu.reciprocal %134 : vector<8x1xf32> -> vector<8x1xf32>
    %136 = vector.broadcast %135 : vector<8x1xf32> to vector<8x8xf32>
    %137 = arith.mulf %132, %136 : vector<8x8xf32>
    %cst_46 = arith.constant dense<0.000000e+00> : vector<8x4xf32>
    %138 = tpu.matmul %137, %126, %cst_46 {dimension_numbers = #tpu.dot_dimension_numbers<[1], [0], [0], [1], [0, 0, 1, 1], [], []>} : vector<8x8xf32>, vector<8x4xf32>, vector<8x4xf32> -> vector<8x4xf32>
    %c0_47 = arith.constant 0 : index
    %c16 = arith.constant 16 : index
    %139 = vector.load %arg9[%c0_47, %c16] : memref<8x32xf32, #tpu.memory_space<vmem>>, vector<8x4xf32>
    tpu.vector_store %arg9[%c0_47, %c16], %138 {strides = array<i32>} : memref<8x32xf32, #tpu.memory_space<vmem>>, vector<8x4xf32>,
    %140 = vector.extract_strided_slice %59 {offsets = [0, 20], sizes = [8, 4], strides = [1, 1]} : vector<8x32xf32> to vector<8x4xf32>
    %141 = vector.extract_strided_slice %30 {offsets = [0, 20], sizes = [8, 4], strides = [1, 1]} : vector<8x64xf32> to vector<8x4xf32>
    %142 = vector.extract_strided_slice %30 {offsets = [0, 52], sizes = [8, 4], strides = [1, 1]} : vector<8x64xf32> to vector<8x4xf32>
    %cst_48 = arith.constant dense<0.000000e+00> : vector<8x8xf32>
    %143 = tpu.matmul %140, %141, %cst_48 {dimension_numbers = #tpu.dot_dimension_numbers<[1], [1], [0], [0], [0, 0, 1, 0], [], []>} : vector<8x4xf32>, vector<8x4xf32>, vector<8x8xf32> -> vector<8x8xf32>
    %cst_49 = arith.constant dense<0xFF800000> : vector<8xf32>
    %144 = vector.multi_reduction <maximumf>, %143, %cst_49 [1] : vector<8x8xf32> to vector<8xf32>
    %145 = vector.shape_cast %144 : vector<8xf32> to vector<8x1xf32>
    %146 = vector.broadcast %145 : vector<8x1xf32> to vector<8x8xf32>
    %147 = arith.subf %143, %146 : vector<8x8xf32>
    %148 = math.exp %147 : vector<8x8xf32>
    %cst_50 = arith.constant dense<0.000000e+00> : vector<8xf32>
    %149 = vector.multi_reduction <add>, %148, %cst_50 [1] : vector<8x8xf32> to vector<8xf32>
    %150 = vector.shape_cast %149 : vector<8xf32> to vector<8x1xf32>
    %151 = tpu.reciprocal %150 : vector<8x1xf32> -> vector<8x1xf32>
    %152 = vector.broadcast %151 : vector<8x1xf32> to vector<8x8xf32>
    %153 = arith.mulf %148, %152 : vector<8x8xf32>
    %cst_51 = arith.constant dense<0.000000e+00> : vector<8x4xf32>
    %154 = tpu.matmul %153, %142, %cst_51 {dimension_numbers = #tpu.dot_dimension_numbers<[1], [0], [0], [1], [0, 0, 1, 1], [], []>} : vector<8x8xf32>, vector<8x4xf32>, vector<8x4xf32> -> vector<8x4xf32>
    %c0_52 = arith.constant 0 : index
    %c20 = arith.constant 20 : index
    %155 = vector.load %arg9[%c0_52, %c20] : memref<8x32xf32, #tpu.memory_space<vmem>>, vector<8x4xf32>
    tpu.vector_store %arg9[%c0_52, %c20], %154 {strides = array<i32>} : memref<8x32xf32, #tpu.memory_space<vmem>>, vector<8x4xf32>,
    %156 = vector.extract_strided_slice %59 {offsets = [0, 24], sizes = [8, 4], strides = [1, 1]} : vector<8x32xf32> to vector<8x4xf32>
    %157 = vector.extract_strided_slice %30 {offsets = [0, 24], sizes = [8, 4], strides = [1, 1]} : vector<8x64xf32> to vector<8x4xf32>
    %158 = vector.extract_strided_slice %30 {offsets = [0, 56], sizes = [8, 4], strides = [1, 1]} : vector<8x64xf32> to vector<8x4xf32>
    %cst_53 = arith.constant dense<0.000000e+00> : vector<8x8xf32>
    %159 = tpu.matmul %156, %157, %cst_53 {dimension_numbers = #tpu.dot_dimension_numbers<[1], [1], [0], [0], [0, 0, 1, 0], [], []>} : vector<8x4xf32>, vector<8x4xf32>, vector<8x8xf32> -> vector<8x8xf32>
    %cst_54 = arith.constant dense<0xFF800000> : vector<8xf32>
    %160 = vector.multi_reduction <maximumf>, %159, %cst_54 [1] : vector<8x8xf32> to vector<8xf32>
    %161 = vector.shape_cast %160 : vector<8xf32> to vector<8x1xf32>
    %162 = vector.broadcast %161 : vector<8x1xf32> to vector<8x8xf32>
    %163 = arith.subf %159, %162 : vector<8x8xf32>
    %164 = math.exp %163 : vector<8x8xf32>
    %cst_55 = arith.constant dense<0.000000e+00> : vector<8xf32>
    %165 = vector.multi_reduction <add>, %164, %cst_55 [1] : vector<8x8xf32> to vector<8xf32>
    %166 = vector.shape_cast %165 : vector<8xf32> to vector<8x1xf32>
    %167 = tpu.reciprocal %166 : vector<8x1xf32> -> vector<8x1xf32>
    %168 = vector.broadcast %167 : vector<8x1xf32> to vector<8x8xf32>
    %169 = arith.mulf %164, %168 : vector<8x8xf32>
    %cst_56 = arith.constant dense<0.000000e+00> : vector<8x4xf32>
    %170 = tpu.matmul %169, %158, %cst_56 {dimension_numbers = #tpu.dot_dimension_numbers<[1], [0], [0], [1], [0, 0, 1, 1], [], []>} : vector<8x8xf32>, vector<8x4xf32>, vector<8x4xf32> -> vector<8x4xf32>
    %c0_57 = arith.constant 0 : index
    %c24 = arith.constant 24 : index
    %171 = vector.load %arg9[%c0_57, %c24] : memref<8x32xf32, #tpu.memory_space<vmem>>, vector<8x4xf32>
    tpu.vector_store %arg9[%c0_57, %c24], %170 {strides = array<i32>} : memref<8x32xf32, #tpu.memory_space<vmem>>, vector<8x4xf32>,
    %172 = vector.extract_strided_slice %59 {offsets = [0, 28], sizes = [8, 4], strides = [1, 1]} : vector<8x32xf32> to vector<8x4xf32>
    %173 = vector.extract_strided_slice %30 {offsets = [0, 28], sizes = [8, 4], strides = [1, 1]} : vector<8x64xf32> to vector<8x4xf32>
    %174 = vector.extract_strided_slice %30 {offsets = [0, 60], sizes = [8, 4], strides = [1, 1]} : vector<8x64xf32> to vector<8x4xf32>
    %cst_58 = arith.constant dense<0.000000e+00> : vector<8x8xf32>
    %175 = tpu.matmul %172, %173, %cst_58 {dimension_numbers = #tpu.dot_dimension_numbers<[1], [1], [0], [0], [0, 0, 1, 0], [], []>} : vector<8x4xf32>, vector<8x4xf32>, vector<8x8xf32> -> vector<8x8xf32>
    %cst_59 = arith.constant dense<0xFF800000> : vector<8xf32>
    %176 = vector.multi_reduction <maximumf>, %175, %cst_59 [1] : vector<8x8xf32> to vector<8xf32>
    %177 = vector.shape_cast %176 : vector<8xf32> to vector<8x1xf32>
    %178 = vector.broadcast %177 : vector<8x1xf32> to vector<8x8xf32>
    %179 = arith.subf %175, %178 : vector<8x8xf32>
    %180 = math.exp %179 : vector<8x8xf32>
    %cst_60 = arith.constant dense<0.000000e+00> : vector<8xf32>
    %181 = vector.multi_reduction <add>, %180, %cst_60 [1] : vector<8x8xf32> to vector<8xf32>
    %182 = vector.shape_cast %181 : vector<8xf32> to vector<8x1xf32>
    %183 = tpu.reciprocal %182 : vector<8x1xf32> -> vector<8x1xf32>
    %184 = vector.broadcast %183 : vector<8x1xf32> to vector<8x8xf32>
    %185 = arith.mulf %180, %184 : vector<8x8xf32>
    %cst_61 = arith.constant dense<0.000000e+00> : vector<8x4xf32>
    %186 = tpu.matmul %185, %174, %cst_61 {dimension_numbers = #tpu.dot_dimension_numbers<[1], [0], [0], [1], [0, 0, 1, 1], [], []>} : vector<8x8xf32>, vector<8x4xf32>, vector<8x4xf32> -> vector<8x4xf32>
    %c0_62 = arith.constant 0 : index
    %c28 = arith.constant 28 : index
    %187 = vector.load %arg9[%c0_62, %c28] : memref<8x32xf32, #tpu.memory_space<vmem>>, vector<8x4xf32>
    tpu.vector_store %arg9[%c0_62, %c28], %186 {strides = array<i32>} : memref<8x32xf32, #tpu.memory_space<vmem>>, vector<8x4xf32>,
    %c0_63 = arith.constant 0 : index
    %c0_64 = arith.constant 0 : index
    %188 = vector.load %arg9[%c0_63, %c0_64] : memref<8x32xf32, #tpu.memory_space<vmem>>, vector<8x32xf32>
    %c0_65 = arith.constant 0 : index
    %c0_66 = arith.constant 0 : index
    %189 = vector.load %arg6[%c0_65, %c0_66] : memref<32x32xf32, #tpu.memory_space<vmem>>, vector<32x32xf32>
    %cst_67 = arith.constant dense<0.000000e+00> : vector<8x32xf32>
    %190 = tpu.matmul %188, %189, %cst_67 {dimension_numbers = #tpu.dot_dimension_numbers<[1], [0], [0], [1], [0, 0, 1, 1], [], []>} : vector<8x32xf32>, vector<32x32xf32>, vector<8x32xf32> -> vector<8x32xf32>
    %c0_68 = arith.constant 0 : index
    %c0_69 = arith.constant 0 : index
    %191 = vector.load %arg7[%c0_68, %c0_69] : memref<1x32xf32, #tpu.memory_space<vmem>>, vector<1x32xf32>
    %192 = vector.broadcast %191 : vector<1x32xf32> to vector<8x32xf32>
    %193 = arith.addf %190, %192 : vector<8x32xf32>
    %194 = arith.addf %33, %193 : vector<8x32xf32>
    %c0_70 = arith.constant 0 : index
    %c0_71 = arith.constant 0 : index
    %c0_72 = arith.constant 0 : index
    %195 = vector.load %arg8[%c0_70, %c0_71, %c0_72] : memref<1x8x32xf32, #tpu.memory_space<vmem>>, vector<1x8x32xf32>
    %196 = vector.shape_cast %195 : vector<1x8x32xf32> to vector<8x32xf32>
    %197 = vector.shape_cast %194 : vector<8x32xf32> to vector<1x8x32xf32>
    tpu.vector_store %arg8[%c0_70, %c0_71, %c0_72], %197 {strides = array<i32>} : memref<1x8x32xf32, #tpu.memory_space<vmem>>, vector<1x8x32xf32>,
    return
  }
  func.func @transform_0(%arg0: i32, %arg1: i32) -> (i32, i32, i32) {
    %c0_i32 = arith.constant 0 : i32
    %c0_i32_0 = arith.constant 0 : i32
    %c0_i32_1 = arith.constant 0 : i32
    return %arg0, %c0_i32, %c0_i32_0 : i32, i32, i32
  }
  func.func @transform_1(%arg0: i32, %arg1: i32) -> (i32, i32) {
    %c0_i32 = arith.constant 0 : i32
    %c0_i32_0 = arith.constant 0 : i32
    %c0_i32_1 = arith.constant 0 : i32
    return %c0_i32, %c0_i32_0 : i32, i32
  }
  func.func @transform_2(%arg0: i32, %arg1: i32) -> (i32, i32) {
    %c0_i32 = arith.constant 0 : i32
    %c0_i32_0 = arith.constant 0 : i32
    %c0_i32_1 = arith.constant 0 : i32
    return %c0_i32, %c0_i32_0 : i32, i32
  }
  func.func @transform_3(%arg0: i32, %arg1: i32) -> (i32, i32) {
    %c0_i32 = arith.constant 0 : i32
    %c0_i32_0 = arith.constant 0 : i32
    %c0_i32_1 = arith.constant 0 : i32
    return %c0_i32, %c0_i32_0 : i32, i32
  }
  func.func @transform_4(%arg0: i32, %arg1: i32) -> (i32, i32) {
    %c0_i32 = arith.constant 0 : i32
    %c0_i32_0 = arith.constant 0 : i32
    %c0_i32_1 = arith.constant 0 : i32
    return %c0_i32, %c0_i32_0 : i32, i32
  }
  func.func @transform_5(%arg0: i32, %arg1: i32) -> (i32, i32) {
    %c0_i32 = arith.constant 0 : i32
    %c0_i32_0 = arith.constant 0 : i32
    %c0_i32_1 = arith.constant 0 : i32
    return %c0_i32, %c0_i32_0 : i32, i32
  }
  func.func @transform_6(%arg0: i32, %arg1: i32) -> (i32, i32, i32) {
    %c0_i32 = arith.constant 0 : i32
    %c0_i32_0 = arith.constant 0 : i32
    return %arg0, %arg1, %c0_i32 : i32, i32, i32
  }
}

module attributes {stable_mosaic.version = 11 : i64} {
  func.func @_ln_attn_kernel(%arg0: i32, %arg1: i32, %arg2: memref<1x8x32xf32, #tpu.memory_space<vmem>>, %arg3: memref<1x32xf32, #tpu.memory_space<vmem>>, %arg4: memref<1x32xf32, #tpu.memory_space<vmem>>, %arg5: memref<32x96xf32, #tpu.memory_space<vmem>>, %arg6: memref<32x32xf32, #tpu.memory_space<vmem>>, %arg7: memref<1x32xf32, #tpu.memory_space<vmem>>, %arg8: memref<1x8x32xf32, #tpu.memory_space<vmem>>, %arg9: memref<8x32xf32, #tpu.memory_space<vmem>>) attributes {dimension_semantics = [#tpu.dimension_semantics<parallel>, #tpu.dimension_semantics<parallel>], iteration_bounds = array<i64: 2, 1>, scalar_prefetch = 0 : i64, scratch_operands = 1 : i64, tpu.core_type = #tpu.core_type<tc>, window_params = [{transform_indices = @transform_0, window_bounds = array<i64: 1, 8, 32>}, {pipeline_mode = #tpu.pipeline_mode<synchronous>, transform_indices = @transform_1, window_bounds = array<i64: 1, 32>}, {pipeline_mode = #tpu.pipeline_mode<synchronous>, transform_indices = @transform_2, window_bounds = array<i64: 1, 32>}, {pipeline_mode = #tpu.pipeline_mode<synchronous>, transform_indices = @transform_3, window_bounds = array<i64: 32, 96>}, {pipeline_mode = #tpu.pipeline_mode<synchronous>, transform_indices = @transform_4, window_bounds = array<i64: 32, 32>}, {pipeline_mode = #tpu.pipeline_mode<synchronous>, transform_indices = @transform_5, window_bounds = array<i64: 1, 32>}, {transform_indices = @transform_6, window_bounds = array<i64: 1, 8, 32>}]} {
    %c8_i32 = arith.constant 8 : i32
    %0 = arith.muli %arg1, %c8_i32 : i32
    %1 = tpu.assume_multiple %0, 8 : i32
    %c0 = arith.constant 0 : index
    %c0_0 = arith.constant 0 : index
    %2 = vector.load %arg3[%c0, %c0_0] : memref<1x32xf32, #tpu.memory_space<vmem>>, vector<1x32xf32>
    %c0_1 = arith.constant 0 : index
    %c0_2 = arith.constant 0 : index
    %3 = vector.load %arg4[%c0_1, %c0_2] : memref<1x32xf32, #tpu.memory_space<vmem>>, vector<1x32xf32>
    %c0_3 = arith.constant 0 : index
    %c0_4 = arith.constant 0 : index
    %4 = vector.load %arg5[%c0_3, %c0_4] : memref<32x96xf32, #tpu.memory_space<vmem>>, vector<32x96xf32>
    %c0_5 = arith.constant 0 : index
    %c0_6 = arith.constant 0 : index
    %c0_7 = arith.constant 0 : index
    %5 = vector.load %arg2[%c0_5, %c0_6, %c0_7] : memref<1x8x32xf32, #tpu.memory_space<vmem>>, vector<1x8x32xf32>
    %6 = vector.shape_cast %5 : vector<1x8x32xf32> to vector<8x32xf32>
    %cst = arith.constant dense<0.000000e+00> : vector<8xf32>
    %7 = vector.multi_reduction <add>, %6, %cst [1] : vector<8x32xf32> to vector<8xf32>
    %8 = vector.shape_cast %7 : vector<8xf32> to vector<8x1xf32>
    %cst_8 = arith.constant 3.200000e+01 : f32
    %9 = vector.broadcast %cst_8 : f32 to vector<8x1xf32>
    %10 = arith.divf %8, %9 : vector<8x1xf32>
    %11 = vector.broadcast %10 : vector<8x1xf32> to vector<8x32xf32>
    %12 = arith.subf %6, %11 : vector<8x32xf32>
    %13 = arith.mulf %12, %12 : vector<8x32xf32>
    %cst_9 = arith.constant dense<0.000000e+00> : vector<8xf32>
    %14 = vector.multi_reduction <add>, %13, %cst_9 [1] : vector<8x32xf32> to vector<8xf32>
    %15 = vector.shape_cast %14 : vector<8xf32> to vector<8x1xf32>
    %cst_10 = arith.constant 3.200000e+01 : f32
    %16 = vector.broadcast %cst_10 : f32 to vector<8x1xf32>
    %17 = arith.divf %15, %16 : vector<8x1xf32>
    %18 = vector.broadcast %10 : vector<8x1xf32> to vector<8x32xf32>
    %19 = arith.subf %6, %18 : vector<8x32xf32>
    %cst_11 = arith.constant 9.99999974E-6 : f32
    %20 = vector.broadcast %cst_11 : f32 to vector<8x1xf32>
    %21 = arith.addf %17, %20 : vector<8x1xf32>
    %22 = math.rsqrt %21 : vector<8x1xf32>
    %23 = vector.broadcast %22 : vector<8x1xf32> to vector<8x32xf32>
    %24 = arith.mulf %19, %23 : vector<8x32xf32>
    %25 = vector.broadcast %2 : vector<1x32xf32> to vector<8x32xf32>
    %26 = arith.mulf %24, %25 : vector<8x32xf32>
    %27 = vector.broadcast %3 : vector<1x32xf32> to vector<8x32xf32>
    %28 = arith.addf %26, %27 : vector<8x32xf32>
    %29 = vector.extract_strided_slice %4 {offsets = [0, 32], sizes = [32, 64], strides = [1, 1]} : vector<32x96xf32> to vector<32x64xf32>
    %cst_12 = arith.constant dense<0.000000e+00> : vector<8x64xf32>
    %30 = tpu.matmul %28, %29, %cst_12 {dimension_numbers = #tpu.dot_dimension_numbers<[1], [0], [0], [1], [0, 0, 1, 1], [], []>} : vector<8x32xf32>, vector<32x64xf32>, vector<8x64xf32> -> vector<8x64xf32>
    %c0_13 = arith.constant 0 : index
    %31 = arith.index_cast %1 : i32 to index
    %c0_14 = arith.constant 0 : index
    %32 = vector.load %arg2[%c0_13, %31, %c0_14] : memref<1x8x32xf32, #tpu.memory_space<vmem>>, vector<1x8x32xf32>
    %33 = vector.shape_cast %32 : vector<1x8x32xf32> to vector<8x32xf32>
    %cst_15 = arith.constant dense<0.000000e+00> : vector<8xf32>
    %34 = vector.multi_reduction <add>, %33, %cst_15 [1] : vector<8x32xf32> to vector<8xf32>
    %35 = vector.shape_cast %34 : vector<8xf32> to vector<8x1xf32>
    %cst_16 = arith.constant 3.200000e+01 : f32
    %36 = vector.broadcast %cst_16 : f32 to vector<8x1xf32>
    %37 = arith.divf %35, %36 : vector<8x1xf32>
    %38 = vector.broadcast %37 : vector<8x1xf32> to vector<8x32xf32>
    %39 = arith.subf %33, %38 : vector<8x32xf32>
    %40 = arith.mulf %39, %39 : vector<8x32xf32>
    %cst_17 = arith.constant dense<0.000000e+00> : vector<8xf32>
    %41 = vector.multi_reduction <add>, %40, %cst_17 [1] : vector<8x32xf32> to vector<8xf32>
    %42 = vector.shape_cast %41 : vector<8xf32> to vector<8x1xf32>
    %cst_18 = arith.constant 3.200000e+01 : f32
    %43 = vector.broadcast %cst_18 : f32 to vector<8x1xf32>
    %44 = arith.divf %42, %43 : vector<8x1xf32>
    %45 = vector.broadcast %37 : vector<8x1xf32> to vector<8x32xf32>
    %46 = arith.subf %33, %45 : vector<8x32xf32>
    %cst_19 = arith.constant 9.99999974E-6 : f32
    %47 = vector.broadcast %cst_19 : f32 to vector<8x1xf32>
    %48 = arith.addf %44, %47 : vector<8x1xf32>
    %49 = math.rsqrt %48 : vector<8x1xf32>
    %50 = vector.broadcast %49 : vector<8x1xf32> to vector<8x32xf32>
    %51 = arith.mulf %46, %50 : vector<8x32xf32>
    %52 = vector.broadcast %2 : vector<1x32xf32> to vector<8x32xf32>
    %53 = arith.mulf %51, %52 : vector<8x32xf32>
    %54 = vector.broadcast %3 : vector<1x32xf32> to vector<8x32xf32>
    %55 = arith.addf %53, %54 : vector<8x32xf32>
    %cst_20 = arith.constant 5.000000e-01 : f32
    %56 = vector.broadcast %cst_20 : f32 to vector<8x32xf32>
    %57 = arith.mulf %55, %56 : vector<8x32xf32>
    %58 = vector.extract_strided_slice %4 {offsets = [0, 0], sizes = [32, 32], strides = [1, 1]} : vector<32x96xf32> to vector<32x32xf32>
    %cst_21 = arith.constant dense<0.000000e+00> : vector<8x32xf32>
    %59 = tpu.matmul %57, %58, %cst_21 {dimension_numbers = #tpu.dot_dimension_numbers<[1], [0], [0], [1], [0, 0, 1, 1], [], []>} : vector<8x32xf32>, vector<32x32xf32>, vector<8x32xf32> -> vector<8x32xf32>
    %60 = vector.extract_strided_slice %59 {offsets = [0, 0], sizes = [8, 4], strides = [1, 1]} : vector<8x32xf32> to vector<8x4xf32>
    %61 = vector.extract_strided_slice %30 {offsets = [0, 0], sizes = [8, 4], strides = [1, 1]} : vector<8x64xf32> to vector<8x4xf32>
    %62 = vector.extract_strided_slice %30 {offsets = [0, 32], sizes = [8, 4], strides = [1, 1]} : vector<8x64xf32> to vector<8x4xf32>
    %cst_22 = arith.constant dense<0.000000e+00> : vector<8x8xf32>
    %63 = tpu.matmul %60, %61, %cst_22 {dimension_numbers = #tpu.dot_dimension_numbers<[1], [1], [0], [0], [0, 0, 1, 0], [], []>} : vector<8x4xf32>, vector<8x4xf32>, vector<8x8xf32> -> vector<8x8xf32>
    %cst_23 = arith.constant dense<0xFF800000> : vector<8xf32>
    %64 = vector.multi_reduction <maximumf>, %63, %cst_23 [1] : vector<8x8xf32> to vector<8xf32>
    %65 = vector.shape_cast %64 : vector<8xf32> to vector<8x1xf32>
    %66 = vector.broadcast %65 : vector<8x1xf32> to vector<8x8xf32>
    %67 = arith.subf %63, %66 : vector<8x8xf32>
    %68 = math.exp %67 : vector<8x8xf32>
    %cst_24 = arith.constant dense<0.000000e+00> : vector<8xf32>
    %69 = vector.multi_reduction <add>, %68, %cst_24 [1] : vector<8x8xf32> to vector<8xf32>
    %70 = vector.shape_cast %69 : vector<8xf32> to vector<8x1xf32>
    %71 = tpu.reciprocal %70 : vector<8x1xf32> -> vector<8x1xf32>
    %72 = vector.broadcast %71 : vector<8x1xf32> to vector<8x8xf32>
    %73 = arith.mulf %68, %72 : vector<8x8xf32>
    %cst_25 = arith.constant dense<0.000000e+00> : vector<8x4xf32>
    %74 = tpu.matmul %73, %62, %cst_25 {dimension_numbers = #tpu.dot_dimension_numbers<[1], [0], [0], [1], [0, 0, 1, 1], [], []>} : vector<8x8xf32>, vector<8x4xf32>, vector<8x4xf32> -> vector<8x4xf32>
    %c0_26 = arith.constant 0 : index
    %c0_27 = arith.constant 0 : index
    %75 = vector.load %arg9[%c0_26, %c0_27] : memref<8x32xf32, #tpu.memory_space<vmem>>, vector<8x4xf32>
    tpu.vector_store %arg9[%c0_26, %c0_27], %74 {strides = array<i32>} : memref<8x32xf32, #tpu.memory_space<vmem>>, vector<8x4xf32>,
    %76 = vector.extract_strided_slice %59 {offsets = [0, 4], sizes = [8, 4], strides = [1, 1]} : vector<8x32xf32> to vector<8x4xf32>
    %77 = vector.extract_strided_slice %30 {offsets = [0, 4], sizes = [8, 4], strides = [1, 1]} : vector<8x64xf32> to vector<8x4xf32>
    %78 = vector.extract_strided_slice %30 {offsets = [0, 36], sizes = [8, 4], strides = [1, 1]} : vector<8x64xf32> to vector<8x4xf32>
    %cst_28 = arith.constant dense<0.000000e+00> : vector<8x8xf32>
    %79 = tpu.matmul %76, %77, %cst_28 {dimension_numbers = #tpu.dot_dimension_numbers<[1], [1], [0], [0], [0, 0, 1, 0], [], []>} : vector<8x4xf32>, vector<8x4xf32>, vector<8x8xf32> -> vector<8x8xf32>
    %cst_29 = arith.constant dense<0xFF800000> : vector<8xf32>
    %80 = vector.multi_reduction <maximumf>, %79, %cst_29 [1] : vector<8x8xf32> to vector<8xf32>
    %81 = vector.shape_cast %80 : vector<8xf32> to vector<8x1xf32>
    %82 = vector.broadcast %81 : vector<8x1xf32> to vector<8x8xf32>
    %83 = arith.subf %79, %82 : vector<8x8xf32>
    %84 = math.exp %83 : vector<8x8xf32>
    %cst_30 = arith.constant dense<0.000000e+00> : vector<8xf32>
    %85 = vector.multi_reduction <add>, %84, %cst_30 [1] : vector<8x8xf32> to vector<8xf32>
    %86 = vector.shape_cast %85 : vector<8xf32> to vector<8x1xf32>
    %87 = tpu.reciprocal %86 : vector<8x1xf32> -> vector<8x1xf32>
    %88 = vector.broadcast %87 : vector<8x1xf32> to vector<8x8xf32>
    %89 = arith.mulf %84, %88 : vector<8x8xf32>
    %cst_31 = arith.constant dense<0.000000e+00> : vector<8x4xf32>
    %90 = tpu.matmul %89, %78, %cst_31 {dimension_numbers = #tpu.dot_dimension_numbers<[1], [0], [0], [1], [0, 0, 1, 1], [], []>} : vector<8x8xf32>, vector<8x4xf32>, vector<8x4xf32> -> vector<8x4xf32>
    %c0_32 = arith.constant 0 : index
    %c4 = arith.constant 4 : index
    %91 = vector.load %arg9[%c0_32, %c4] : memref<8x32xf32, #tpu.memory_space<vmem>>, vector<8x4xf32>
    tpu.vector_store %arg9[%c0_32, %c4], %90 {strides = array<i32>} : memref<8x32xf32, #tpu.memory_space<vmem>>, vector<8x4xf32>,
    %92 = vector.extract_strided_slice %59 {offsets = [0, 8], sizes = [8, 4], strides = [1, 1]} : vector<8x32xf32> to vector<8x4xf32>
    %93 = vector.extract_strided_slice %30 {offsets = [0, 8], sizes = [8, 4], strides = [1, 1]} : vector<8x64xf32> to vector<8x4xf32>
    %94 = vector.extract_strided_slice %30 {offsets = [0, 40], sizes = [8, 4], strides = [1, 1]} : vector<8x64xf32> to vector<8x4xf32>
    %cst_33 = arith.constant dense<0.000000e+00> : vector<8x8xf32>
    %95 = tpu.matmul %92, %93, %cst_33 {dimension_numbers = #tpu.dot_dimension_numbers<[1], [1], [0], [0], [0, 0, 1, 0], [], []>} : vector<8x4xf32>, vector<8x4xf32>, vector<8x8xf32> -> vector<8x8xf32>
    %cst_34 = arith.constant dense<0xFF800000> : vector<8xf32>
    %96 = vector.multi_reduction <maximumf>, %95, %cst_34 [1] : vector<8x8xf32> to vector<8xf32>
    %97 = vector.shape_cast %96 : vector<8xf32> to vector<8x1xf32>
    %98 = vector.broadcast %97 : vector<8x1xf32> to vector<8x8xf32>
    %99 = arith.subf %95, %98 : vector<8x8xf32>
    %100 = math.exp %99 : vector<8x8xf32>
    %cst_35 = arith.constant dense<0.000000e+00> : vector<8xf32>
    %101 = vector.multi_reduction <add>, %100, %cst_35 [1] : vector<8x8xf32> to vector<8xf32>
    %102 = vector.shape_cast %101 : vector<8xf32> to vector<8x1xf32>
    %103 = tpu.reciprocal %102 : vector<8x1xf32> -> vector<8x1xf32>
    %104 = vector.broadcast %103 : vector<8x1xf32> to vector<8x8xf32>
    %105 = arith.mulf %100, %104 : vector<8x8xf32>
    %cst_36 = arith.constant dense<0.000000e+00> : vector<8x4xf32>
    %106 = tpu.matmul %105, %94, %cst_36 {dimension_numbers = #tpu.dot_dimension_numbers<[1], [0], [0], [1], [0, 0, 1, 1], [], []>} : vector<8x8xf32>, vector<8x4xf32>, vector<8x4xf32> -> vector<8x4xf32>
    %c0_37 = arith.constant 0 : index
    %c8 = arith.constant 8 : index
    %107 = vector.load %arg9[%c0_37, %c8] : memref<8x32xf32, #tpu.memory_space<vmem>>, vector<8x4xf32>
    tpu.vector_store %arg9[%c0_37, %c8], %106 {strides = array<i32>} : memref<8x32xf32, #tpu.memory_space<vmem>>, vector<8x4xf32>,
    %108 = vector.extract_strided_slice %59 {offsets = [0, 12], sizes = [8, 4], strides = [1, 1]} : vector<8x32xf32> to vector<8x4xf32>
    %109 = vector.extract_strided_slice %30 {offsets = [0, 12], sizes = [8, 4], strides = [1, 1]} : vector<8x64xf32> to vector<8x4xf32>
    %110 = vector.extract_strided_slice %30 {offsets = [0, 44], sizes = [8, 4], strides = [1, 1]} : vector<8x64xf32> to vector<8x4xf32>
    %cst_38 = arith.constant dense<0.000000e+00> : vector<8x8xf32>
    %111 = tpu.matmul %108, %109, %cst_38 {dimension_numbers = #tpu.dot_dimension_numbers<[1], [1], [0], [0], [0, 0, 1, 0], [], []>} : vector<8x4xf32>, vector<8x4xf32>, vector<8x8xf32> -> vector<8x8xf32>
    %cst_39 = arith.constant dense<0xFF800000> : vector<8xf32>
    %112 = vector.multi_reduction <maximumf>, %111, %cst_39 [1] : vector<8x8xf32> to vector<8xf32>
    %113 = vector.shape_cast %112 : vector<8xf32> to vector<8x1xf32>
    %114 = vector.broadcast %113 : vector<8x1xf32> to vector<8x8xf32>
    %115 = arith.subf %111, %114 : vector<8x8xf32>
    %116 = math.exp %115 : vector<8x8xf32>
    %cst_40 = arith.constant dense<0.000000e+00> : vector<8xf32>
    %117 = vector.multi_reduction <add>, %116, %cst_40 [1] : vector<8x8xf32> to vector<8xf32>
    %118 = vector.shape_cast %117 : vector<8xf32> to vector<8x1xf32>
    %119 = tpu.reciprocal %118 : vector<8x1xf32> -> vector<8x1xf32>
    %120 = vector.broadcast %119 : vector<8x1xf32> to vector<8x8xf32>
    %121 = arith.mulf %116, %120 : vector<8x8xf32>
    %cst_41 = arith.constant dense<0.000000e+00> : vector<8x4xf32>
    %122 = tpu.matmul %121, %110, %cst_41 {dimension_numbers = #tpu.dot_dimension_numbers<[1], [0], [0], [1], [0, 0, 1, 1], [], []>} : vector<8x8xf32>, vector<8x4xf32>, vector<8x4xf32> -> vector<8x4xf32>
    %c0_42 = arith.constant 0 : index
    %c12 = arith.constant 12 : index
    %123 = vector.load %arg9[%c0_42, %c12] : memref<8x32xf32, #tpu.memory_space<vmem>>, vector<8x4xf32>
    tpu.vector_store %arg9[%c0_42, %c12], %122 {strides = array<i32>} : memref<8x32xf32, #tpu.memory_space<vmem>>, vector<8x4xf32>,
    %124 = vector.extract_strided_slice %59 {offsets = [0, 16], sizes = [8, 4], strides = [1, 1]} : vector<8x32xf32> to vector<8x4xf32>
    %125 = vector.extract_strided_slice %30 {offsets = [0, 16], sizes = [8, 4], strides = [1, 1]} : vector<8x64xf32> to vector<8x4xf32>
    %126 = vector.extract_strided_slice %30 {offsets = [0, 48], sizes = [8, 4], strides = [1, 1]} : vector<8x64xf32> to vector<8x4xf32>
    %cst_43 = arith.constant dense<0.000000e+00> : vector<8x8xf32>
    %127 = tpu.matmul %124, %125, %cst_43 {dimension_numbers = #tpu.dot_dimension_numbers<[1], [1], [0], [0], [0, 0, 1, 0], [], []>} : vector<8x4xf32>, vector<8x4xf32>, vector<8x8xf32> -> vector<8x8xf32>
    %cst_44 = arith.constant dense<0xFF800000> : vector<8xf32>
    %128 = vector.multi_reduction <maximumf>, %127, %cst_44 [1] : vector<8x8xf32> to vector<8xf32>
    %129 = vector.shape_cast %128 : vector<8xf32> to vector<8x1xf32>
    %130 = vector.broadcast %129 : vector<8x1xf32> to vector<8x8xf32>
    %131 = arith.subf %127, %130 : vector<8x8xf32>
    %132 = math.exp %131 : vector<8x8xf32>
    %cst_45 = arith.constant dense<0.000000e+00> : vector<8xf32>
    %133 = vector.multi_reduction <add>, %132, %cst_45 [1] : vector<8x8xf32> to vector<8xf32>
    %134 = vector.shape_cast %133 : vector<8xf32> to vector<8x1xf32>
    %135 = tpu.reciprocal %134 : vector<8x1xf32> -> vector<8x1xf32>
    %136 = vector.broadcast %135 : vector<8x1xf32> to vector<8x8xf32>
    %137 = arith.mulf %132, %136 : vector<8x8xf32>
    %cst_46 = arith.constant dense<0.000000e+00> : vector<8x4xf32>
    %138 = tpu.matmul %137, %126, %cst_46 {dimension_numbers = #tpu.dot_dimension_numbers<[1], [0], [0], [1], [0, 0, 1, 1], [], []>} : vector<8x8xf32>, vector<8x4xf32>, vector<8x4xf32> -> vector<8x4xf32>
    %c0_47 = arith.constant 0 : index
    %c16 = arith.constant 16 : index
    %139 = vector.load %arg9[%c0_47, %c16] : memref<8x32xf32, #tpu.memory_space<vmem>>, vector<8x4xf32>
    tpu.vector_store %arg9[%c0_47, %c16], %138 {strides = array<i32>} : memref<8x32xf32, #tpu.memory_space<vmem>>, vector<8x4xf32>,
    %140 = vector.extract_strided_slice %59 {offsets = [0, 20], sizes = [8, 4], strides = [1, 1]} : vector<8x32xf32> to vector<8x4xf32>
    %141 = vector.extract_strided_slice %30 {offsets = [0, 20], sizes = [8, 4], strides = [1, 1]} : vector<8x64xf32> to vector<8x4xf32>
    %142 = vector.extract_strided_slice %30 {offsets = [0, 52], sizes = [8, 4], strides = [1, 1]} : vector<8x64xf32> to vector<8x4xf32>
    %cst_48 = arith.constant dense<0.000000e+00> : vector<8x8xf32>
    %143 = tpu.matmul %140, %141, %cst_48 {dimension_numbers = #tpu.dot_dimension_numbers<[1], [1], [0], [0], [0, 0, 1, 0], [], []>} : vector<8x4xf32>, vector<8x4xf32>, vector<8x8xf32> -> vector<8x8xf32>
    %cst_49 = arith.constant dense<0xFF800000> : vector<8xf32>
    %144 = vector.multi_reduction <maximumf>, %143, %cst_49 [1] : vector<8x8xf32> to vector<8xf32>
    %145 = vector.shape_cast %144 : vector<8xf32> to vector<8x1xf32>
    %146 = vector.broadcast %145 : vector<8x1xf32> to vector<8x8xf32>
    %147 = arith.subf %143, %146 : vector<8x8xf32>
    %148 = math.exp %147 : vector<8x8xf32>
    %cst_50 = arith.constant dense<0.000000e+00> : vector<8xf32>
    %149 = vector.multi_reduction <add>, %148, %cst_50 [1] : vector<8x8xf32> to vector<8xf32>
    %150 = vector.shape_cast %149 : vector<8xf32> to vector<8x1xf32>
    %151 = tpu.reciprocal %150 : vector<8x1xf32> -> vector<8x1xf32>
    %152 = vector.broadcast %151 : vector<8x1xf32> to vector<8x8xf32>
    %153 = arith.mulf %148, %152 : vector<8x8xf32>
    %cst_51 = arith.constant dense<0.000000e+00> : vector<8x4xf32>
    %154 = tpu.matmul %153, %142, %cst_51 {dimension_numbers = #tpu.dot_dimension_numbers<[1], [0], [0], [1], [0, 0, 1, 1], [], []>} : vector<8x8xf32>, vector<8x4xf32>, vector<8x4xf32> -> vector<8x4xf32>
    %c0_52 = arith.constant 0 : index
    %c20 = arith.constant 20 : index
    %155 = vector.load %arg9[%c0_52, %c20] : memref<8x32xf32, #tpu.memory_space<vmem>>, vector<8x4xf32>
    tpu.vector_store %arg9[%c0_52, %c20], %154 {strides = array<i32>} : memref<8x32xf32, #tpu.memory_space<vmem>>, vector<8x4xf32>,
    %156 = vector.extract_strided_slice %59 {offsets = [0, 24], sizes = [8, 4], strides = [1, 1]} : vector<8x32xf32> to vector<8x4xf32>
    %157 = vector.extract_strided_slice %30 {offsets = [0, 24], sizes = [8, 4], strides = [1, 1]} : vector<8x64xf32> to vector<8x4xf32>
    %158 = vector.extract_strided_slice %30 {offsets = [0, 56], sizes = [8, 4], strides = [1, 1]} : vector<8x64xf32> to vector<8x4xf32>
    %cst_53 = arith.constant dense<0.000000e+00> : vector<8x8xf32>
    %159 = tpu.matmul %156, %157, %cst_53 {dimension_numbers = #tpu.dot_dimension_numbers<[1], [1], [0], [0], [0, 0, 1, 0], [], []>} : vector<8x4xf32>, vector<8x4xf32>, vector<8x8xf32> -> vector<8x8xf32>
    %cst_54 = arith.constant dense<0xFF800000> : vector<8xf32>
    %160 = vector.multi_reduction <maximumf>, %159, %cst_54 [1] : vector<8x8xf32> to vector<8xf32>
    %161 = vector.shape_cast %160 : vector<8xf32> to vector<8x1xf32>
    %162 = vector.broadcast %161 : vector<8x1xf32> to vector<8x8xf32>
    %163 = arith.subf %159, %162 : vector<8x8xf32>
    %164 = math.exp %163 : vector<8x8xf32>
    %cst_55 = arith.constant dense<0.000000e+00> : vector<8xf32>
    %165 = vector.multi_reduction <add>, %164, %cst_55 [1] : vector<8x8xf32> to vector<8xf32>
    %166 = vector.shape_cast %165 : vector<8xf32> to vector<8x1xf32>
    %167 = tpu.reciprocal %166 : vector<8x1xf32> -> vector<8x1xf32>
    %168 = vector.broadcast %167 : vector<8x1xf32> to vector<8x8xf32>
    %169 = arith.mulf %164, %168 : vector<8x8xf32>
    %cst_56 = arith.constant dense<0.000000e+00> : vector<8x4xf32>
    %170 = tpu.matmul %169, %158, %cst_56 {dimension_numbers = #tpu.dot_dimension_numbers<[1], [0], [0], [1], [0, 0, 1, 1], [], []>} : vector<8x8xf32>, vector<8x4xf32>, vector<8x4xf32> -> vector<8x4xf32>
    %c0_57 = arith.constant 0 : index
    %c24 = arith.constant 24 : index
    %171 = vector.load %arg9[%c0_57, %c24] : memref<8x32xf32, #tpu.memory_space<vmem>>, vector<8x4xf32>
    tpu.vector_store %arg9[%c0_57, %c24], %170 {strides = array<i32>} : memref<8x32xf32, #tpu.memory_space<vmem>>, vector<8x4xf32>,
    %172 = vector.extract_strided_slice %59 {offsets = [0, 28], sizes = [8, 4], strides = [1, 1]} : vector<8x32xf32> to vector<8x4xf32>
    %173 = vector.extract_strided_slice %30 {offsets = [0, 28], sizes = [8, 4], strides = [1, 1]} : vector<8x64xf32> to vector<8x4xf32>
    %174 = vector.extract_strided_slice %30 {offsets = [0, 60], sizes = [8, 4], strides = [1, 1]} : vector<8x64xf32> to vector<8x4xf32>
    %cst_58 = arith.constant dense<0.000000e+00> : vector<8x8xf32>
    %175 = tpu.matmul %172, %173, %cst_58 {dimension_numbers = #tpu.dot_dimension_numbers<[1], [1], [0], [0], [0, 0, 1, 0], [], []>} : vector<8x4xf32>, vector<8x4xf32>, vector<8x8xf32> -> vector<8x8xf32>
    %cst_59 = arith.constant dense<0xFF800000> : vector<8xf32>
    %176 = vector.multi_reduction <maximumf>, %175, %cst_59 [1] : vector<8x8xf32> to vector<8xf32>
    %177 = vector.shape_cast %176 : vector<8xf32> to vector<8x1xf32>
    %178 = vector.broadcast %177 : vector<8x1xf32> to vector<8x8xf32>
    %179 = arith.subf %175, %178 : vector<8x8xf32>
    %180 = math.exp %179 : vector<8x8xf32>
    %cst_60 = arith.constant dense<0.000000e+00> : vector<8xf32>
    %181 = vector.multi_reduction <add>, %180, %cst_60 [1] : vector<8x8xf32> to vector<8xf32>
    %182 = vector.shape_cast %181 : vector<8xf32> to vector<8x1xf32>
    %183 = tpu.reciprocal %182 : vector<8x1xf32> -> vector<8x1xf32>
    %184 = vector.broadcast %183 : vector<8x1xf32> to vector<8x8xf32>
    %185 = arith.mulf %180, %184 : vector<8x8xf32>
    %cst_61 = arith.constant dense<0.000000e+00> : vector<8x4xf32>
    %186 = tpu.matmul %185, %174, %cst_61 {dimension_numbers = #tpu.dot_dimension_numbers<[1], [0], [0], [1], [0, 0, 1, 1], [], []>} : vector<8x8xf32>, vector<8x4xf32>, vector<8x4xf32> -> vector<8x4xf32>
    %c0_62 = arith.constant 0 : index
    %c28 = arith.constant 28 : index
    %187 = vector.load %arg9[%c0_62, %c28] : memref<8x32xf32, #tpu.memory_space<vmem>>, vector<8x4xf32>
    tpu.vector_store %arg9[%c0_62, %c28], %186 {strides = array<i32>} : memref<8x32xf32, #tpu.memory_space<vmem>>, vector<8x4xf32>,
    %c0_63 = arith.constant 0 : index
    %c0_64 = arith.constant 0 : index
    %188 = vector.load %arg9[%c0_63, %c0_64] : memref<8x32xf32, #tpu.memory_space<vmem>>, vector<8x32xf32>
    %c0_65 = arith.constant 0 : index
    %c0_66 = arith.constant 0 : index
    %189 = vector.load %arg6[%c0_65, %c0_66] : memref<32x32xf32, #tpu.memory_space<vmem>>, vector<32x32xf32>
    %cst_67 = arith.constant dense<0.000000e+00> : vector<8x32xf32>
    %190 = tpu.matmul %188, %189, %cst_67 {dimension_numbers = #tpu.dot_dimension_numbers<[1], [0], [0], [1], [0, 0, 1, 1], [], []>} : vector<8x32xf32>, vector<32x32xf32>, vector<8x32xf32> -> vector<8x32xf32>
    %c0_68 = arith.constant 0 : index
    %c0_69 = arith.constant 0 : index
    %191 = vector.load %arg7[%c0_68, %c0_69] : memref<1x32xf32, #tpu.memory_space<vmem>>, vector<1x32xf32>
    %192 = vector.broadcast %191 : vector<1x32xf32> to vector<8x32xf32>
    %193 = arith.addf %190, %192 : vector<8x32xf32>
    %194 = arith.addf %33, %193 : vector<8x32xf32>
    %c0_70 = arith.constant 0 : index
    %c0_71 = arith.constant 0 : index
    %c0_72 = arith.constant 0 : index
    %195 = vector.load %arg8[%c0_70, %c0_71, %c0_72] : memref<1x8x32xf32, #tpu.memory_space<vmem>>, vector<1x8x32xf32>
    %196 = vector.shape_cast %195 : vector<1x8x32xf32> to vector<8x32xf32>
    %197 = vector.shape_cast %194 : vector<8x32xf32> to vector<1x8x32xf32>
    tpu.vector_store %arg8[%c0_70, %c0_71, %c0_72], %197 {strides = array<i32>} : memref<1x8x32xf32, #tpu.memory_space<vmem>>, vector<1x8x32xf32>,
    return
  }
  func.func @transform_0(%arg0: i32, %arg1: i32) -> (i32, i32, i32) {
    %c0_i32 = arith.constant 0 : i32
    %c0_i32_0 = arith.constant 0 : i32
    %c0_i32_1 = arith.constant 0 : i32
    return %arg0, %c0_i32, %c0_i32_0 : i32, i32, i32
  }
  func.func @transform_1(%arg0: i32, %arg1: i32) -> (i32, i32) {
    %c0_i32 = arith.constant 0 : i32
    %c0_i32_0 = arith.constant 0 : i32
    %c0_i32_1 = arith.constant 0 : i32
    return %c0_i32, %c0_i32_0 : i32, i32
  }
  func.func @transform_2(%arg0: i32, %arg1: i32) -> (i32, i32) {
    %c0_i32 = arith.constant 0 : i32
    %c0_i32_0 = arith.constant 0 : i32
    %c0_i32_1 = arith.constant 0 : i32
    return %c0_i32, %c0_i32_0 : i32, i32
  }
  func.func @transform_3(%arg0: i32, %arg1: i32) -> (i32, i32) {
    %c0_i32 = arith.constant 0 : i32
    %c0_i32_0 = arith.constant 0 : i32
    %c0_i32_1 = arith.constant 0 : i32
    return %c0_i32, %c0_i32_0 : i32, i32
  }
  func.func @transform_4(%arg0: i32, %arg1: i32) -> (i32, i32) {
    %c0_i32 = arith.constant 0 : i32
    %c0_i32_0 = arith.constant 0 : i32
    %c0_i32_1 = arith.constant 0 : i32
    return %c0_i32, %c0_i32_0 : i32, i32
  }
  func.func @transform_5(%arg0: i32, %arg1: i32) -> (i32, i32) {
    %c0_i32 = arith.constant 0 : i32
    %c0_i32_0 = arith.constant 0 : i32
    %c0_i32_1 = arith.constant 0 : i32
    return %c0_i32, %c0_i32_0 : i32, i32
  }
  func.func @transform_6(%arg0: i32, %arg1: i32) -> (i32, i32, i32) {
    %c0_i32 = arith.constant 0 : i32
    %c0_i32_0 = arith.constant 0 : i32
    return %arg0, %arg1, %c0_i32 : i32, i32, i32
  }
}

</mosaic_0001>

<bundles_post_ra>
// kernel: tpu_custom_call.1
= control target key start
LH: loop header
LB: loop body
LE: loop exit
PB: predicated region body
PF: predicated region fallthrough
CT: control target
= control target key end

     0   :  { %11 = vsyncpa [#allocation4], 0  ;;  %s3139_s0 = inlined_call_operand.hbm [shape: f32[2,8,32], index: 0, kind: input, shape index: {}]   ;;  %s3140_s1 = inlined_call_operand.vmem [shape: f32[1,32], index: 1, kind: input, shape index: {}]   ;;  %s3141_s2 = inlined_call_operand.vmem [shape: f32[1,32], index: 2, kind: input, shape index: {}]   ;;  %s3142_s3 = inlined_call_operand.hbm [shape: f32[32,96], index: 3, kind: input, shape index: {}]   ;;  %s3143_s4 = inlined_call_operand.hbm [shape: f32[32,32], index: 4, kind: input, shape index: {}]   ;;  %s3144_s5 = inlined_call_operand.vmem [shape: f32[1,32], index: 5, kind: input, shape index: {}]   ;;  %s3145_s6 = inlined_call_operand.hbm [shape: f32[2,8,32], index: 6, kind: output, shape index: {}]  }
   0x1   :  { %13 = vsyncpa [#allocation4 + $0x1], 0 }
   0x2   :  { %14 = vsyncpa [#allocation7], 0 }
   0x3   :  { %15 = vsyncpa [#allocation5], 0 }
   0x4   :  { %17 = vsyncpa [#allocation5 + $0x1], 0  ;;  %s2713_s21 = smov 0   ;;  %s2715_s22 = smov 0  }
   0x5   :  { %s2717_s23 = smov 0   ;;  %s2719_s24 = smov 0  }
   0x6   :  { %s2721_s25 = smov 0   ;;  %s2723_s26 = smov 0  }
   0x7 LB: > { %s2092_s27 = sadd.s32 4294967295, %s2645_s26   ;;  %s2093_s28 = sadd.s32 4294967294, %s2645_s26   ;;  %s2645_s26 = sphi %s2723_s26, %s23_s26   ;;  %s2641_s25 = sphi %s2721_s25, %s3170_s25   ;;  %s2637_s24 = sphi %s2719_s24, %s3169_s24   ;;  %s2633_s23 = sphi %s2717_s23, %s3168_s23   ;;  %s2629_s22 = sphi %s2715_s22, %s3167_s22   ;;  %s2625_s21 = sphi %s2713_s21, %s3166_s21  }
   0x8   : > { %p55_p0 = scmp.ne.s32.totalorder %s2629_s22, %s2625_s21  ;;  %p2747_p1 = scmp.eq.s32.totalorder %s2092_s27, 0 }
   0x9   : > { %p2751_p2 = scmp.eq.s32.totalorder %s2092_s27, 1  ;;  %p192_p3 = scmp.eq.s32.totalorder %s2093_s28, 1 }
   0xa   : > { %s3151_s29 = scalar_select %p2747_p1, 1, 0 }
   0xb   : > { %p2757_p4 = por %p2747_p1, %p55_p0  ;;  %p2094_p5 = scmp.ge.s32.totalorder %s2645_s26, 1 }
   0xc   : > { %p2762_p6 = por %p192_p3, %p55_p0  ;;  %p199_p7 = scmp.lt.s32.totalorder %s2645_s26, 3 }
   0xd   : > { %s3153_s7 = scalar_select %p2757_p4, 1, 0 }
   0xe   : > { %s3154_s8 = scalar_select %p2762_p6, 1, 0 }
   0xf   : > { %p2767_p8 = pnand %p2094_p5, %p199_p7  ;;  %s2647_s10 = smov [#allocation6]  }
  0x10   : > { %3155 = sst [smem:[#allocation13_spill]] %s3154_s8  ;;  %s217_s11 = sshll.u32 %s2647_s10, 4  ;;  %s2771_s11 = int_to_ptr.vmem [resolvable:$true] %s217_s11 }
  0x11   : > { %p2329_p9 = pneg %p2767_p8  ;;  %s2648_s13 = smov [#allocation8]  }
  0x12   : > { %s230_s14 = sshll.u32 %s2648_s13, 4  ;;  %s2473_s17 = scalar_lea.hbm %s3142_s3, 512  ;;  %s2782_s14 = int_to_ptr.vmem [resolvable:$true] %s230_s14 }
  0x13   : > { %p2778_p11 = pnand %p2329_p9, %p2747_p1  ;;  %p2474_p12 = scmp.ne.s32.totalorder %s3142_s3, %s2473_s17 }
  0x14   : > { %p2480_p5 = scmp.lt.u32.totalorder %s2473_s17, %s3142_s3 }
  0x15   : > { %p2475_p13 = pneg %p2778_p11 }
  0x17   : > { %p2476_p0 = pnand %p2475_p13, %p2474_p12 }
  0x19   : > { %p2477_p3 = pneg %p2476_p0 }
  0x1b   : > { %p2482_p7 = pnand %p2480_p5, %p2477_p3 }
  0x1d   : > { %2485 = shalt.err (!%p2482_p7)
}
  0x1e   : > { %s2486_s28 = scalar_lea.vmem %s2771_s11, 512  ;;  %p2494_p1 = scmp.lt.s32.totalorder %s2771_s11, %s2771_s11 }
  0x1f   : > { %p2487_p9 = scmp.ne.s32.totalorder %s2771_s11, %s2486_s28  ;;  %p2495_p12 = scmp.lt.s32.totalorder %s2486_s28, %s2486_s28 }
  0x21   : > { %p2489_p10 = pnand %p2487_p9, %p2475_p13  ;;  %p2496_p0 = por %p2495_p12, %p2494_p1 }
  0x23   : > { %p2490_p6 = pneg %p2489_p10 }
  0x25   : > { %p2497_p4 = pnand %p2496_p0, %p2490_p6 }
  0x27   : > { %2500 = shalt.err (!%p2497_p4)
}
  0x28   : > { %s2649_s10 = smov 128   ;;  %s2650_s13 = smov 8  }
  0x29   : > { %2332 = dma.hbm_to_vmem [thread:$0]  (!%p2778_p11), %s3142_s3, 512, %s2771_s11, [#allocation7], %s2649_s10, %s2649_s10, %s2650_s13  }
  0x2a   : > { %s2501_s19 = scalar_lea.hbm %s3143_s4, 512 }
  0x2b   : > { %p2502_p1 = scmp.ne.s32.totalorder %s3143_s4, %s2501_s19  ;;  %p2508_p10 = scmp.lt.u32.totalorder %s2501_s19, %s3143_s4 }
  0x2d   : > { %p2504_p4 = pnand %p2502_p1, %p2475_p13 }
  0x2f   : > { %p2505_p6 = pneg %p2504_p4 }
  0x31   : > { %p2510_p3 = pnand %p2508_p10, %p2505_p6 }
  0x33   : > { %2513 = shalt.err (!%p2510_p3)
}
  0x34   : > { %s2514_s11 = scalar_lea.vmem %s2782_s14, 512  ;;  %p2522_p12 = scmp.lt.s32.totalorder %s2782_s14, %s2782_s14 }
  0x35   : > { %p2515_p5 = scmp.ne.s32.totalorder %s2782_s14, %s2514_s11  ;;  %p2523_p0 = scmp.lt.s32.totalorder %s2514_s11, %s2514_s11 }
  0x37   : > { %p2517_p7 = pnand %p2515_p5, %p2475_p13  ;;  %p2524_p1 = por %p2523_p0, %p2522_p12 }
  0x39   : > { %p2518_p9 = pneg %p2517_p7 }
  0x3b   : > { %p2525_p4 = pnand %p2524_p1, %p2518_p9 }
  0x3d   : > { %2528 = shalt.err (!%p2525_p4)
}
  0x3e   : > { %2335 = dma.hbm_to_vmem [thread:$0]  (!%p2778_p11), %s3143_s4, 512, %s2782_s14, [#allocation7], %s2649_s10, %s2649_s10, %s2650_s13  }
  0x3f   : > { %s35_s16 = sadd.s32 1, %s2641_s25  ;;  %s42_s17 = sadd.s32 1, %s2633_s23 }
  0x40   : > { %p37_p13 = scmp.ge.s32.totalorder %s35_s16, 2  ;;  %p49_p6 = scmp.ne.s32.totalorder %s2633_s23, %s2629_s22 }
  0x41   : > { %p50_p10 = scmp.eq.s32.totalorder %s2645_s26, 0  ;;  %p2346_p3 = scmp.lt.s32.totalorder %s2645_s26, 2 }
  0x42   : > { %s3172_s16 = smov (%p37_p13, %s35_s16), 0  ;;  %p2846_p7 = por %p2751_p2, %p49_p6 }
  0x43   : > { %p51_p5 = por %p50_p10, %p49_p6  ;;  %s39_s18 = ssub.s32 %s2641_s25, %s3172_s16 }
  0x44   : > { %s3158_s12 = scalar_select %p2846_p7, 1, 0 }
  0x45   : > { %s247_s19 = sand.u32 1, %s2633_s23   ;;  %p40_p9 = scmp.eq.s32.totalorder %s39_s18, 0 }
  0x46   : > { %s2098_s14 = sshll.u32 %s247_s19, 3  ;;  %s2099_s10 = sshll.u32 %s2641_s25, 7 }
  0x47   : > { %s2855_s13 = scalar_select %p40_p9, %s2633_s23, %s42_s17  }
  0x48   : > { %s2860_s28 = scalar_lea.hbm %s3139_s0, %s2099_s10  ;;  %s251_s30 = scalar_lea.vmem [#allocation3], %s2098_s14 }
  0x49   : > { %s258_s11 = sshll.u32 %s251_s30, 4  ;;  %p2864_p2 = pnand %p2346_p3, %p51_p5  ;;  %s2868_s11 = int_to_ptr.vmem [resolvable:$true] %s258_s11 }
  0x4a   : > { %s248_s15 = scalar_lea.sflag [#allocation4], %s247_s19  ;;  %s2529_s17 = scalar_lea.hbm %s2860_s28, 128 }
  0x4b   : > { %p2530_p11 = scmp.ne.s32.totalorder %s2860_s28, %s2529_s17  ;;  %p2531_p12 = pneg %p2864_p2 }
  0x4c   : > { %s2534_s10 = scalar_lea.hbm %s3139_s0, 256  ;;  %p2535_p4 = scmp.lt.u32.totalorder %s2860_s28, %s3139_s0 }
  0x4d   : > { %p2532_p0 = pnand %p2531_p12, %p2530_p11  ;;  %p2536_p13 = scmp.lt.u32.totalorder %s2534_s10, %s2529_s17 }
  0x4e   : > { %p2538_p10 = scmp.lt.u32.totalorder %s2529_s17, %s2860_s28 }
  0x4f   : > { %p2533_p1 = pneg %p2532_p0  ;;  %p2537_p6 = por %p2536_p13, %p2535_p4 }
  0x51   : > { %p2539_p3 = por %p2538_p10, %p2537_p6 }
  0x53   : > { %p2540_p5 = pnand %p2539_p3, %p2533_p1 }
  0x55   : > { %2543 = shalt.err (!%p2540_p5)
}
  0x56   : > { %s2544_s19 = scalar_lea.vmem %s2868_s11, 128  ;;  %s2651_s30 = smov [#allocation3]  }
  0x57   : > { %p2545_p9 = scmp.ne.s32.totalorder %s2868_s11, %s2544_s19  ;;  %s2549_s18 = sshll.u32 %s2651_s30, 4  ;;  %s2550_s18 = int_to_ptr.vmem [resolvable:$false] %s2549_s18 }
  0x58   : > { %s2551_s14 = scalar_lea.vmem %s2550_s18, 256  ;;  %p2552_p7 = scmp.lt.s32.totalorder %s2868_s11, %s2550_s18 }
  0x59   : > { %p2547_p11 = pnand %p2545_p9, %p2531_p12  ;;  %p2553_p4 = scmp.lt.s32.totalorder %s2551_s14, %s2544_s19 }
  0x5b   : > { %p2548_p0 = pneg %p2547_p11  ;;  %p2554_p13 = por %p2553_p4, %p2552_p7 }
  0x5d   : > { %p2555_p6 = pnand %p2554_p13, %p2548_p0 }
  0x5f   : > { %2558 = shalt.err (!%p2555_p6)
}
  0x60   : > { %2339 = dma.hbm_to_vmem [thread:$0]  (!%p2864_p2), %s2860_s28, 128, %s2868_s11, %s248_s15  }
  0x61   : > { %267 = sbr.rel (%p2767_p8) target bundleno = 1915 (0x77b), region = 44  ;;  %s2898_s17 = sand.u32 (!%p2767_p8), 1, %s2629_s22  }
  0x62   : > { %s2101_s10 = sshll.u32 (!%p2767_p8), %s2898_s17, 3  ;;  %s270_s20 = scalar_lea.sflag (!%p2767_p8), [#allocation4], %s2898_s17 }
  0x63   : > { %s273_s27 = scalar_lea.vmem (!%p2767_p8), [#allocation3], %s2101_s10  ;;  %p3160_p7 = scmp.ne.s32.totalorder (!%p2767_p8), %s3153_s7, 0 }
  0x68   : > { %2612 = dma.done.wait (%p3160_p7), %s270_s20, 128  }
  0x69   : > { %2614 = vsyncadd (%p3160_p7), %s270_s20, 4294967168  ;;  %p3161_p2 = scmp.ne.s32.totalorder %s3151_s29, 0 }
  0x6b   : > { %2616 = dma.done.wait (%p3161_p2), [#allocation7], 1024  }
  0x6c   : > { %2618 = vsyncadd (%p3161_p2), [#allocation7], 4294966272  ;;  %vm318_vm0 = vcmask 261120   ;;  %v2912_v0 = vld [vmem:[%s273_s27] sm:$0xff]  ;;  %v313_v2 = vld [vmem:[#allocation6] sm:$0xff]  ;;  %s2652_s9 = smov 96  }
  0x6d   : > { %v319_v1 = vsel %vm318_vm0, %v2912_v0, 0.0  ;;  %v314_v3 = vld [vmem:[#allocation6 + $0x8] sm:$0xff]  ;;  %v315_v15 = vld [vmem:[#allocation6 + $0x10] sm:$0xff]  ;;  %v316_v16 = vld [vmem:[#allocation6 + $0x18] sm:$0xff]  ;;  %v2653_v21 = vmov 0.0|0.0   ;;  %vm2654_vm1 = vmmov 0  }
  0x6e   : > { %320 = vadd.xlane.f32.xlu0 %v319_v1  ;;  %v2427_v4 = vpack.i.bf16 %v314_v3, %v313_v2  ;;  %v2432_v17 = vpack.i.bf16 %v316_v16, %v315_v15  ;;  %2299 = vmatprep.subr.bf16.mxu0 %v2653_v21  ;;  %v2306_v23 = vpack.c.bf16 %v314_v3, %v313_v2  ;;  %v2655_v24 = vmov 0.0   ;;  %v2105_v37 = vld [vmem:[%s3140_s1] ss:$0 sm:$0xff]  ;;  %s2656_s8 = smov 120   ;;  %s2657_s15 = smov 124  }
  0x6f   : > { %2305 = vmatprep.subr.bf16.mxu1 %v2653_v21  ;;  %2194 = vmatprep.mubr.msk.f32.mxu0 %vm2654_vm1, %v2655_v24  ;;  %v2309_v25 = vpack.c.bf16 %v316_v16, %v315_v15  ;;  %v2106_v39 = vld [vmem:[%s3141_s2] ss:$0 sm:$0xff]  ;;  %vm527_vm2 = vcmask 31744   ;;  %s2658_s19 = smov 116   ;;  %s2659_s30 = smov 112   ;;  %vm604_vm3 = vcmask 64512  }
  0x70   : > { %2307 = vmatpush3.bf16.msra.mxu1 %v2306_v23  ;;  %2205 = vmatprep.mubr.msk.f32.mxu1 %vm2654_vm1, %v2655_v24  ;;  %s2660_s18 = smov 108   ;;  %s2661_s14 = smov 104   ;;  %vm862_vm4 = vcmask 64544   ;;  %vm1033_vm5 = vcmask 97344   ;;  %vm1204_vm6 = vcmask 130144   ;;  %vm1375_vm7 = vcmask 162944  }
  0x71   : > { %2308 = vmatprep.subr.bf16.mxu1 %v2653_v21  ;;  %s2662_s20 = smov 100   ;;  %s2663_s27 = smov 92   ;;  %vm1546_vm8 = vcmask 195744   ;;  %vm1717_vm9 = vcmask 228544   ;;  %vm1888_vm10 = vcmask 261344  }
  0x72   : > { %439 = vadd.xlane.f32.xlu0 %v319_v1  ;;  %s2664_s29 = smov 88   ;;  %s2665_s7 = smov 84  }
  0x73   : > { %s2666_s28 = smov 80   ;;  %s2668_s11 = smov 68  }
  0x74   : > { %2310 = vmatpush3.bf16.msra.mxu1 %v2309_v25  ;;  %p3162_p12 = scmp.ne.s32.totalorder %s3158_s12, 0 }
  0x75   : > { %2208 = vmatprep.subr.mxu1 %v2655_v24 }
  0x88   : > { %2428 = vrot.lane.b32.xlu0 %v2427_v4, %s2652_s9 }
  0xfb   : > { %v321_v5 = vpop.xlane.xlu0 %320 }
  0xfc   : > { %v323_v6 = vmul.f32 0.03125, %v321_v5 }
  0xfe   : > { %v324_v7 = vsub.f32 %v2912_v0, %v323_v6 }
  0xff   : > { %v440_v8 = vpop.xlane.xlu0 %439 }
 0x100   : > { %v441_v9 = vmul.f32 0.03125, %v440_v8  ;;  %v325_v10 = vmul.f32 %v324_v7, %v324_v7 }
 0x102   : > { %v442_v11 = vsub.f32 %v2912_v0, %v441_v9  ;;  %v326_v12 = vsel %vm318_vm0, %v325_v10, 0.0 }
 0x103   : > { %327 = vadd.xlane.f32.xlu1 %v326_v12  ;;  %v2429_v18 = vpop.permute.xlu0 %2428 }
 0x104   : > { %v443_v13 = vmul.f32 %v442_v11, %v442_v11  ;;  %v2431_v19 = vunpack.i.h.bf16 %v2429_v18  ;;  %v2430_v20 = vunpack.i.l.bf16 %v2429_v18 }
 0x106   : > { %v444_v14 = vsel %vm318_vm0, %v443_v13, 0.0  ;;  %v2300_v22 = vpack.c.bf16 %v2431_v19, %v2430_v20 }
 0x107   : > { %445 = vadd.xlane.f32.xlu1 %v444_v14 }
 0x108   : > { %2301 = vmatpush3.bf16.msra.mxu0 %v2300_v22 }
 0x109   : > { %2302 = vmatprep.subr.bf16.mxu0 %v2653_v21 }
 0x118   : > { %2433 = vrot.lane.b32.xlu1 %v2432_v17, %s2652_s9 }
 0x190   : > { %v328_v26 = vpop.xlane.xlu1 %327 }
 0x191   : > { %v329_v27 = vmul.f32 0.03125, %v328_v26 }
 0x193   : > { %v330_v28 = vadd.f32 1e-05, %v329_v27 }
 0x194   : > { %v446_v29 = vpop.xlane.xlu1 %445 }
 0x195   : > { %2437 = vrsqrt.f32 %v330_v28  ;;  %v447_v30 = vmul.f32 0.03125, %v446_v29 }
 0x197   : > { %v448_v31 = vadd.f32 1e-05, %v447_v30 }
 0x198   : > { %v2434_v32 = vpop.permute.xlu1 %2433 }
 0x199   : > { %2439 = vrsqrt.f32 %v448_v31  ;;  %v2436_v33 = vunpack.i.h.bf16 %v2434_v32  ;;  %v2435_v34 = vunpack.i.l.bf16 %v2434_v32 }
 0x19b   : > { %v2303_v35 = vpack.c.bf16 %v2436_v33, %v2435_v34 }
 0x19d   : > { %2304 = vmatpush3.bf16.msra.mxu0 %v2303_v35 }
 0x19e   : > { %2218 = vmatprep.subr.mxu0 %v2655_v24 }
 0x19f   : > { %v2438_v36 = vpop.eup %2437 }
 0x1a0   : > { %v332_v38 = vmul.f32 %v2438_v36, %v324_v7 }
 0x1a2   : > { %v339_v40 = vmul.f32 %v2105_v37, %v332_v38 }
 0x1a3   : > { %v2440_v41 = vpop.eup %2439 }
 0x1a4   : > { %v346_v42 = vadd.f32 %v2106_v39, %v339_v40  ;;  %v450_v43 = vmul.f32 %v2440_v41, %v442_v11 }
 0x1a6   : > { %2195 = vmatmul.mubr.msk.f32.vlgmr.msra.gmra.mrb[0].mxu0 %vm318_vm0, %v346_v42  ;;  %v451_v44 = vmul.f32 %v2105_v37, %v450_v43 }
 0x1a7   : > { %2220 = vmatprep.mubr.msk.f32.mxu0 %vm2654_vm1, %v2655_v24 }
 0x1a8   : > { %v452_v45 = vadd.f32 %v2106_v39, %v451_v44 }
 0x1aa   : > { %v453_v46 = vmul.f32 0.5, %v452_v45 }
 0x1ac   : > { %2206 = vmatmul.mubr.msk.f32.vlgmr.msra.gmra.mrb[0].mxu1 %vm318_vm0, %v453_v46 }
 0x1ad   : > { %2210 = vmatprep.mubr.msk.f32.mxu1 %vm2654_vm1, %v2655_v24 }
 0x279   : > { %v2944_v47 = vpop.f32.mrb[0].mxu0 }
 0x27a   : > { %866 = vrot.lane.b32.xlu0 %v2944_v47, %s2656_s8  ;;  %695 = vrot.lane.b32.xlu1 %v2944_v47, %s2657_s15  ;;  %v2196_v48 = vpop.f32.mrb[1].mxu0 }
 0x27b   : > { %2209 = vmatpush3.xpose.msk.msra.mxu1 %vm527_vm2, %v2944_v47 }
 0x27c   : > { %2213 = vmatprep.subr.mxu1 %v2655_v24 }
 0x27e   : > { %1037 = vrot.lane.b32.xlu0 %v2944_v47, %s2658_s19 }
 0x27f   : > { %v523_v49 = vpop.f32.mrb[0].mxu1 }
 0x280   : > { %v2207_v50 = vpop.f32.mrb[1].mxu1  ;;  %693 = vrot.lane.b32.xlu1 %v523_v49, %s2657_s15  ;;  %2211 = vmatmul.mubr.msk.f32.vlgmr.msra.gmra.mrb[2].mxu1 %vm527_vm2, %v523_v49  ;;  %s2670_s15 = smov 4  }
 0x281   : > { %2215 = vmatprep.mubr.msk.f32.mxu1 %vm2654_vm1, %v2655_v24 }
 0x282   : > { %1208 = vrot.lane.b32.xlu0 %v2944_v47, %s2659_s30 }
 0x284   : > { %864 = vrot.lane.b32.xlu1 %v523_v49, %s2656_s8  ;;  %s2669_s8 = smov 72  }
 0x286   : > { %1379 = vrot.lane.b32.xlu0 %v2944_v47, %s2660_s18 }
 0x288   : > { %1035 = vrot.lane.b32.xlu1 %v523_v49, %s2658_s19  ;;  %s2671_s19 = smov 8  }
 0x28a   : > { %1550 = vrot.lane.b32.xlu0 %v2944_v47, %s2661_s14 }
 0x28c   : > { %1206 = vrot.lane.b32.xlu1 %v523_v49, %s2659_s30  ;;  %s2672_s30 = smov 12  }
 0x28e   : > { %1721 = vrot.lane.b32.xlu0 %v2944_v47, %s2662_s20 }
 0x290   : > { %1377 = vrot.lane.b32.xlu1 %v523_v49, %s2660_s18  ;;  %s2673_s18 = smov 16  }
 0x294   : > { %1548 = vrot.lane.b32.xlu1 %v523_v49, %s2661_s14  ;;  %s2674_s14 = smov 20  }
 0x298   : > { %1719 = vrot.lane.b32.xlu1 %v523_v49, %s2662_s20  ;;  %s2675_s20 = smov 24  }
 0x2ec   : > { %v867_v51 = vpop.permute.xlu0 %866  ;;  %v696_v52 = vpop.permute.xlu1 %695 }
 0x2ed   : > { %2219 = vmatpush3.xpose.msk.msra.mxu0 %vm527_vm2, %v696_v52 }
 0x2ee   : > { %2228 = vmatprep.subr.mxu0 %v2655_v24 }
 0x2f0   : > { %v1038_v53 = vpop.permute.xlu0 %1037 }
 0x2f2   : > { %v694_v54 = vpop.permute.xlu1 %693 }
 0x2f3   : > { %2221 = vmatmul.mubr.msk.f32.vlgmr.msra.gmra.mrb[2].mxu0 %vm527_vm2, %v694_v54 }
 0x2f4   : > { %2229 = vmatpush3.xpose.msk.msra.mxu0 %vm527_vm2, %v867_v51  ;;  %2230 = vmatprep.mubr.msk.f32.mxu0 %vm2654_vm1, %v2655_v24  ;;  %v1209_v55 = vpop.permute.xlu0 %1208 }
 0x2f5   : > { %2238 = vmatprep.subr.mxu0 %v2655_v24 }
 0x2f6   : > { %v865_v56 = vpop.permute.xlu1 %864 }
 0x2f7   : > { %2231 = vmatmul.mubr.msk.f32.vlgmr.msra.gmra.mrb[4].mxu0 %vm527_vm2, %v865_v56 }
 0x2f8   : > { %2239 = vmatpush3.xpose.msk.msra.mxu0 %vm527_vm2, %v1038_v53  ;;  %2240 = vmatprep.mubr.msk.f32.mxu0 %vm2654_vm1, %v2655_v24  ;;  %v1380_v58 = vpop.permute.xlu0 %1379 }
 0x2f9   : > { %2248 = vmatprep.subr.mxu0 %v2655_v24 }
 0x2fa   : > { %v1036_v57 = vpop.permute.xlu1 %1035 }
 0x2fb   : > { %2241 = vmatmul.mubr.msk.f32.vlgmr.msra.gmra.mrb[6].mxu0 %vm527_vm2, %v1036_v57 }
 0x2fc   : > { %2249 = vmatpush3.xpose.msk.msra.mxu0 %vm527_vm2, %v1209_v55  ;;  %2250 = vmatprep.mubr.msk.f32.mxu0 %vm2654_vm1, %v2655_v24  ;;  %v1551_v60 = vpop.permute.xlu0 %1550 }
 0x2fd   : > { %2258 = vmatprep.subr.mxu0 %v2655_v24 }
 0x2fe   : > { %v1207_v59 = vpop.permute.xlu1 %1206 }
 0x2ff   : > { %2251 = vmatmul.mubr.msk.f32.vlgmr.msra.gmra.mrb[8].mxu0 %vm527_vm2, %v1207_v59 }
 0x300   : > { %2259 = vmatpush3.xpose.msk.msra.mxu0 %vm527_vm2, %v1380_v58  ;;  %2260 = vmatprep.mubr.msk.f32.mxu0 %vm2654_vm1, %v2655_v24  ;;  %v1722_v63 = vpop.permute.xlu0 %1721 }
 0x301   : > { %2268 = vmatprep.subr.mxu0 %v2655_v24 }
 0x302   : > { %v1378_v61 = vpop.permute.xlu1 %1377 }
 0x303   : > { %2261 = vmatmul.mubr.msk.f32.vlgmr.msra.gmra.mrb[10].mxu0 %vm527_vm2, %v1378_v61 }
 0x304   : > { %2269 = vmatpush3.xpose.msk.msra.mxu0 %vm527_vm2, %v1551_v60  ;;  %2270 = vmatprep.mubr.msk.f32.mxu0 %vm2654_vm1, %v2655_v24 }
 0x305   : > { %2278 = vmatprep.subr.mxu0 %v2655_v24 }
 0x306   : > { %v1549_v62 = vpop.permute.xlu1 %1548 }
 0x307   : > { %2271 = vmatmul.mubr.msk.f32.vlgmr.msra.gmra.mrb[12].mxu0 %vm527_vm2, %v1549_v62 }
 0x308   : > { %2279 = vmatpush3.xpose.msk.msra.mxu0 %vm527_vm2, %v1722_v63  ;;  %2280 = vmatprep.mubr.msk.f32.mxu0 %vm2654_vm1, %v2655_v24 }
 0x309   : > { %2311 = vmatprep.subr.bf16.mxu0 %v2653_v21 }
 0x30a   : > { %v1720_v1 = vpop.permute.xlu1 %1719 }
 0x30b   : > { %2281 = vmatmul.mubr.msk.f32.vlgmr.msra.gmra.mrb[14].mxu0 %vm527_vm2, %v1720_v1 }
 0x30c   : > { %2296 = vmatprep.mubr.msk.f32.mxu0 %vm2654_vm1, %v2655_v24 }
 0x353   : > { %v600_v2 = vpop.f32.mrb[2].mxu1 }
 0x354   : > { %v2212_v3 = vpop.f32.mrb[3].mxu1  ;;  %v605_v4 = vsel %vm604_vm3, %v600_v2, -inf }
 0x355   : > { %606 = vmax.xlane.f32.xlu0 %v605_v4 }
 0x3c6   : > { %v767_v5 = vpop.f32.mrb[2].mxu0 }
 0x3c7   : > { %v2222_v6 = vpop.f32.mrb[3].mxu0  ;;  %v771_v7 = vsel %vm604_vm3, %v767_v5, -inf }
 0x3c8   : > { %772 = vmax.xlane.f32.xlu1 %v771_v7 }
 0x3ca   : > { %v938_v8 = vpop.f32.mrb[4].mxu0 }
 0x3cb   : > { %v2232_v9 = vpop.f32.mrb[5].mxu0  ;;  %v942_v10 = vsel %vm604_vm3, %v938_v8, -inf }
 0x3cc   : > { %943 = vmax.xlane.f32.xlu0 %v942_v10 }
 0x3ce   : > { %v1109_v11 = vpop.f32.mrb[6].mxu0 }
 0x3cf   : > { %v2242_v12 = vpop.f32.mrb[7].mxu0  ;;  %v1113_v13 = vsel %vm604_vm3, %v1109_v11, -inf }
 0x3d0   : > { %1114 = vmax.xlane.f32.xlu0 %v1113_v13 }
 0x3d2   : > { %v1280_v14 = vpop.f32.mrb[8].mxu0 }
 0x3d3   : > { %v2252_v15 = vpop.f32.mrb[9].mxu0  ;;  %v1284_v16 = vsel %vm604_vm3, %v1280_v14, -inf }
 0x3d4   : > { %1285 = vmax.xlane.f32.xlu0 %v1284_v16 }
 0x3d6   : > { %v2999_v17 = vpop.f32.mrb[10].mxu0 }
 0x3d7   : > { %v2262_v18 = vpop.f32.mrb[11].mxu0  ;;  %v1455_v19 = vsel %vm604_vm3, %v2999_v17, -inf }
 0x3d8   : > { %1456 = vmax.xlane.f32.xlu1 %v1455_v19 }
 0x3da   : > { %v1622_v20 = vpop.f32.mrb[12].mxu0 }
 0x3db   : > { %v2272_v22 = vpop.f32.mrb[13].mxu0  ;;  %v1626_v23 = vsel %vm604_vm3, %v1622_v20, -inf }
 0x3dc   : > { %1627 = vmax.xlane.f32.xlu0 %v1626_v23 }
 0x3de   : > { %v3004_v25 = vpop.f32.mrb[14].mxu0 }
 0x3df   : > { %v2282_v26 = vpop.f32.mrb[15].mxu0  ;;  %v1797_v32 = vsel %vm604_vm3, %v3004_v25, -inf }
 0x3e2   : > { %v607_v27 = vpop.xlane.xlu0 %606 }
 0x3e3   : > { %v608_v28 = vsub.f32 %v600_v2, %v607_v27 }
 0x3e5   : > { %v609_v29 = vmul.f32 1.442695, %v608_v28 }
 0x3e7   : > { %2441 = vpow2.f32 %v609_v29 }
 0x3e9   : > { %616 = vrot.lane.b32.xlu1 %v2944_v47, %s2652_s9  ;;  %s2667_s9 = smov 76  }
 0x3f1   : > { %v2442_v30 = vpop.eup %2441 }
 0x3f2   : > { %v611_v31 = vsel %vm604_vm3, %v2442_v30, 0.0 }
 0x3f3   : > { %612 = vadd.xlane.f32.xlu0 %v611_v31 }
 0x409   : > { %782 = vrot.lane.b32.xlu0 %v2944_v47, %s2663_s27  ;;  %s2676_s27 = smov 28  }
 0x40d   : > { %1798 = vmax.xlane.f32.xlu1 %v1797_v32 }
 0x41e   : > { %953 = vrot.lane.b32.xlu1 %v2944_v47, %s2664_s29 }
 0x422   : > { %1124 = vrot.lane.b32.xlu1 %v2944_v47, %s2665_s7 }
 0x426   : > { %1295 = vrot.lane.b32.xlu1 %v2944_v47, %s2666_s28  ;;  %s2136_s28 = sshll.u32 %s2637_s24, 7  ;;  %s1978_s24 = scalar_lea.sflag [#allocation5], %s2898_s17 }
 0x455   : > { %v773_v33 = vpop.xlane.xlu1 %772 }
 0x456   : > { %v774_v34 = vsub.f32 %v767_v5, %v773_v33 }
 0x458   : > { %v775_v35 = vmul.f32 1.442695, %v774_v34 }
 0x459   : > { %v944_v36 = vpop.xlane.xlu0 %943 }
 0x45a   : > { %2443 = vpow2.f32 %v775_v35  ;;  %v945_v37 = vsub.f32 %v938_v8, %v944_v36 }
 0x45c   : > { %v946_v38 = vmul.f32 1.442695, %v945_v37 }
 0x45d   : > { %v1115_v39 = vpop.xlane.xlu0 %1114 }
 0x45e   : > { %2445 = vpow2.f32 %v946_v38  ;;  %v1116_v40 = vsub.f32 %v1109_v11, %v1115_v39 }
 0x460   : > { %v1117_v41 = vmul.f32 1.442695, %v1116_v40 }
 0x461   : > { %v1286_v42 = vpop.xlane.xlu0 %1285 }
 0x462   : > { %2447 = vpow2.f32 %v1117_v41  ;;  %v1287_v43 = vsub.f32 %v1280_v14, %v1286_v42 }
 0x464   : > { %v3015_v44 = vpop.eup %2443  ;;  %v1288_v45 = vmul.f32 1.442695, %v1287_v43 }
 0x465   : > { %v1457_v46 = vpop.xlane.xlu1 %1456  ;;  %v777_v48 = vsel %vm604_vm3, %v3015_v44, 0.0 }
 0x466   : > { %2449 = vpow2.f32 %v1288_v45  ;;  %778 = vadd.xlane.f32.xlu1 %v777_v48  ;;  %v1458_v1 = vsub.f32 %v2999_v17, %v1457_v46 }
 0x468   : > { %v3019_v49 = vpop.eup %2445  ;;  %v1459_v3 = vmul.f32 1.442695, %v1458_v1 }
 0x469   : > { %v617_v50 = vpop.permute.xlu1 %616  ;;  %v1628_v51 = vpop.xlane.xlu0 %1627  ;;  %v948_v52 = vsel %vm604_vm3, %v3019_v49, 0.0 }
 0x46a   : > { %v1629_v53 = vsub.f32 %v1622_v20, %v1628_v51  ;;  %2214 = vmatpush3.msra.mxu1 %v617_v50  ;;  %949 = vadd.xlane.f32.xlu0 %v948_v52  ;;  %v1892_v50 = vld [vmem:[#allocation8 + $0x8] sm:$0xff]  ;;  %v1893_v52 = vld [vmem:[#allocation8 + $0x10] sm:$0xff] }
 0x46b   : > { %2223 = vmatprep.subr.mxu1 %v2655_v24 }
 0x46c   : > { %v2448_v54 = vpop.eup %2447  ;;  %v1630_v55 = vmul.f32 1.442695, %v1629_v53  ;;  %v1894_v53 = vld [vmem:[#allocation8 + $0x18] sm:$0xff] }
 0x46d   : > { %v1119_v56 = vsel %vm604_vm3, %v2448_v54, 0.0 }
 0x46e   : > { %2451 = vpow2.f32 %v1630_v55  ;;  %1120 = vadd.xlane.f32.xlu1 %v1119_v56 }
 0x470   : > { %v3025_v57 = vpop.eup %2449 }
 0x471   : > { %v1290_v58 = vsel %vm604_vm3, %v3025_v57, 0.0 }
 0x472   : > { %1291 = vadd.xlane.f32.xlu0 %v1290_v58 }
 0x478   : > { %v3029_v59 = vpop.eup %2451 }
 0x479   : > { %v1632_v60 = vsel %vm604_vm3, %v3029_v59, 0.0 }
 0x47a   : > { %1633 = vadd.xlane.f32.xlu0 %v1632_v60 }
 0x47f   : > { %1466 = vrot.lane.b32.xlu1 %v2944_v47, %s2667_s9  ;;  %s309_s9 = scalar_lea.vmem [#allocation9], %s2101_s10  ;;  %s2677_s10 = smov [#allocation9]  }
 0x480   : > { %v613_v61 = vpop.xlane.xlu0 %612 }
 0x481   : > { %2453 = vrcp.f32 %v613_v61 }
 0x482   : > { %2455 = vpow2.f32 %v1459_v3 }
 0x484   : > { %v783_v2 = vpop.permute.xlu0 %782 }
 0x48b   : > { %v2454_v62 = vpop.eup %2453 }
 0x48c   : > { %v615_v63 = vmul.f32 %v2454_v62, %v2442_v30  ;;  %v2456_v7 = vpop.eup %2455 }
 0x48d   : > { %v1461_v8 = vsel %vm604_vm3, %v2456_v7, 0.0 }
 0x48e   : > { %2216 = vmatmul.mubr.msk.f32.vlgmr.msra.gmra.mrb[4].mxu1 %vm604_vm3, %v615_v63 }
 0x48f   : > { %2224 = vmatpush3.msra.mxu1 %v783_v2  ;;  %2225 = vmatprep.mubr.msk.f32.mxu1 %vm2654_vm1, %v2655_v24 }
 0x490   : > { %2233 = vmatprep.subr.mxu1 %v2655_v24 }
 0x49a   : > { %v1799_v4 = vpop.xlane.xlu1 %1798 }
 0x49b   : > { %v1800_v5 = vsub.f32 %v3004_v25, %v1799_v4 }
 0x49d   : > { %v1801_v6 = vmul.f32 1.442695, %v1800_v5  ;;  %v2133_v5 = vld [vmem:[%s3144_s5] ss:$0 sm:$0xff] }
 0x49e   : > { %v954_v11 = vpop.permute.xlu1 %953 }
 0x49f   : > { %2457 = vpow2.f32 %v1801_v6 }
 0x4a2   : > { %v1125_v12 = vpop.permute.xlu1 %1124 }
 0x4a3   : > { %1462 = vadd.xlane.f32.xlu1 %v1461_v8 }
 0x4a6   : > { %v1296_v13 = vpop.permute.xlu1 %1295 }
 0x4a9   : > { %v3041_v9 = vpop.eup %2457 }
 0x4aa   : > { %v1803_v10 = vsel %vm604_vm3, %v3041_v9, 0.0 }
 0x4ab   : > { %1804 = vadd.xlane.f32.xlu0 %v1803_v10 }
 0x4b4   : > { %1808 = vrot.lane.b32.xlu1 %v2944_v47, %s2668_s11  ;;  %s1992_s11 = sshll.u32 %s309_s9, 4  ;;  %s3091_s11 = int_to_ptr.vmem [resolvable:$true] %s1992_s11 }
 0x4c1   : > { %1637 = vrot.lane.b32.xlu0 %v2944_v47, %s2669_s8 }
 0x4f3   : > { %v779_v14 = vpop.xlane.xlu1 %778 }
 0x4f4   : > { %2459 = vrcp.f32 %v779_v14 }
 0x4f7   : > { %v950_v15 = vpop.xlane.xlu0 %949 }
 0x4f8   : > { %2461 = vrcp.f32 %v950_v15 }
 0x4fb   : > { %v1121_v16 = vpop.xlane.xlu1 %1120 }
 0x4fc   : > { %2463 = vrcp.f32 %v1121_v16 }
 0x4fe   : > { %v2460_v17 = vpop.eup %2459 }
 0x4ff   : > { %v781_v18 = vmul.f32 %v2460_v17, %v3015_v44  ;;  %v1292_v19 = vpop.xlane.xlu0 %1291  ;;  %v1467_v27 = vpop.permute.xlu1 %1466 }
 0x500   : > { %2465 = vrcp.f32 %v1292_v19 }
 0x501   : > { %2226 = vmatmul.mubr.msk.f32.vlgmr.msra.gmra.mrb[6].mxu1 %vm604_vm3, %v781_v18 }
 0x502   : > { %v2462_v20 = vpop.eup %2461  ;;  %2234 = vmatpush3.msra.mxu1 %v954_v11  ;;  %2235 = vmatprep.mubr.msk.f32.mxu1 %vm2654_vm1, %v2655_v24 }
 0x503   : > { %v952_v47 = vmul.f32 %v2462_v20, %v3019_v49  ;;  %2243 = vmatprep.subr.mxu1 %v2655_v24  ;;  %v1891_v49 = vld [vmem:[#allocation8] sm:$0xff] }
 0x504   : > { %v2312_v51 = vpack.c.bf16 %v1892_v50, %v1891_v49 }
 0x505   : > { %2236 = vmatmul.mubr.msk.f32.vlgmr.msra.gmra.mrb[8].mxu1 %vm604_vm3, %v952_v47 }
 0x506   : > { %v2464_v22 = vpop.eup %2463  ;;  %2244 = vmatpush3.msra.mxu1 %v1125_v12  ;;  %2245 = vmatprep.mubr.msk.f32.mxu1 %vm2654_vm1, %v2655_v24 }
 0x507   : > { %v1123_v23 = vmul.f32 %v2464_v22, %v2448_v54  ;;  %2253 = vmatprep.subr.mxu1 %v2655_v24  ;;  %v1634_v28 = vpop.xlane.xlu0 %1633  ;;  %2313 = vmatpush3.bf16.msra.mxu0 %v2312_v51  ;;  %v2315_v54 = vpack.c.bf16 %v1894_v53, %v1893_v52 }
 0x508   : > { %2314 = vmatprep.subr.bf16.mxu0 %v2653_v21 }
 0x509   : > { %2246 = vmatmul.mubr.msk.f32.vlgmr.msra.gmra.mrb[10].mxu1 %vm604_vm3, %v1123_v23 }
 0x50a   : > { %v2466_v25 = vpop.eup %2465  ;;  %2254 = vmatpush3.msra.mxu1 %v1296_v13  ;;  %2255 = vmatprep.mubr.msk.f32.mxu1 %vm2654_vm1, %v2655_v24 }
 0x50b   : > { %v1294_v26 = vmul.f32 %v2466_v25, %v3025_v57  ;;  %2263 = vmatprep.subr.mxu1 %v2655_v24  ;;  %2316 = vmatpush3.bf16.msra.mxu0 %v2315_v54 }
 0x50d   : > { %2256 = vmatmul.mubr.msk.f32.vlgmr.msra.gmra.mrb[12].mxu1 %vm604_vm3, %v1294_v26 }
 0x50e   : > { %2264 = vmatpush3.msra.mxu1 %v1467_v27  ;;  %2265 = vmatprep.mubr.msk.f32.mxu1 %vm2654_vm1, %v2655_v24 }
 0x50f   : > { %2273 = vmatprep.subr.mxu1 %v2655_v24 }
 0x530   : > { %v1463_v29 = vpop.xlane.xlu1 %1462 }
 0x531   : > { %2467 = vrcp.f32 %v1463_v29 }
 0x532   : > { %2469 = vrcp.f32 %v1634_v28 }
 0x534   : > { %v1809_v36 = vpop.permute.xlu1 %1808 }
 0x538   : > { %v1805_v30 = vpop.xlane.xlu0 %1804 }
 0x539   : > { %2471 = vrcp.f32 %v1805_v30 }
 0x53b   : > { %v2468_v31 = vpop.eup %2467 }
 0x53c   : > { %v1465_v32 = vmul.f32 %v2468_v31, %v2456_v7  ;;  %v1638_v33 = vpop.permute.xlu0 %1637  ;;  %v2470_v34 = vpop.eup %2469 }
 0x53d   : > { %v1636_v35 = vmul.f32 %v2470_v34, %v3029_v59 }
 0x53e   : > { %2266 = vmatmul.mubr.msk.f32.vlgmr.msra.gmra.mrb[14].mxu1 %vm604_vm3, %v1465_v32 }
 0x53f   : > { %2274 = vmatpush3.msra.mxu1 %v1638_v33  ;;  %2275 = vmatprep.mubr.msk.f32.mxu1 %vm2654_vm1, %v2655_v24 }
 0x540   : > { %2283 = vmatprep.subr.mxu1 %v2655_v24 }
 0x542   : > { %2276 = vmatmul.mubr.msk.f32.vlgmr.msra.gmra.mrb[16].mxu1 %vm604_vm3, %v1636_v35 }
 0x543   : > { %v2472_v37 = vpop.eup %2471  ;;  %2284 = vmatpush3.msra.mxu1 %v1809_v36  ;;  %2285 = vmatprep.mubr.msk.f32.mxu1 %vm2654_vm1, %v2655_v24 }
 0x544   : > { %v1807_v38 = vmul.f32 %v2472_v37, %v3041_v9 }
 0x546   : > { %2286 = vmatmul.mubr.msk.f32.vlgmr.msra.gmra.mrb[18].mxu1 %vm604_vm3, %v1807_v38 }
 0x561   : > { %v688_v39 = vpop.f32.mrb[4].mxu1 }
 0x562   : > { %692 = vst.msk [vmem:[#allocation2] sm:$0xff] %vm527_vm2, %v688_v39  ;;  %v2217_v40 = vpop.f32.mrb[5].mxu1 }
 0x5d4   : > { %v854_v41 = vpop.f32.mrb[6].mxu1 }
 0x5d5   : > { %859 = vrot.lane.b32.xlu0 %v854_v41, %s2670_s15  ;;  %v2227_v42 = vpop.f32.mrb[7].mxu1 }
 0x5d8   : > { %v1025_v43 = vpop.f32.mrb[8].mxu1 }
 0x5d9   : > { %1030 = vrot.lane.b32.xlu1 %v1025_v43, %s2671_s19  ;;  %v2237_v44 = vpop.f32.mrb[9].mxu1  ;;  %s3089_s19 = scalar_lea.hbm %s3145_s6, %s2136_s28 }
 0x5dc   : > { %v1196_v45 = vpop.f32.mrb[10].mxu1 }
 0x5dd   : > { %1201 = vrot.lane.b32.xlu0 %v1196_v45, %s2672_s30  ;;  %v2247_v24 = vpop.f32.mrb[11].mxu1  ;;  %s2559_s30 = scalar_lea.vmem %s3091_s11, 128 }
 0x5de   : > { %p2560_p8 = scmp.ne.s32.totalorder %s3091_s11, %s2559_s30 }
 0x5e0   : > { %v1367_v46 = vpop.f32.mrb[12].mxu1  ;;  %p2561_p1 = pnand %p2560_p8, %p3162_p12 }
 0x5e1   : > { %1372 = vrot.lane.b32.xlu1 %v1367_v46, %s2673_s18  ;;  %v2257_v48 = vpop.f32.mrb[13].mxu1  ;;  %s2563_s18 = sshll.u32 %s2677_s10, 4  ;;  %s2564_s18 = int_to_ptr.vmem [resolvable:$false] %s2563_s18 }
 0x5e2   : > { %p2562_p10 = pneg %p2561_p1  ;;  %p2566_p3 = scmp.lt.s32.totalorder %s3091_s11, %s2564_s18 }
 0x611   : > { %v1538_v55 = vpop.f32.mrb[14].mxu1 }
 0x612   : > { %1543 = vrot.lane.b32.xlu0 %v1538_v55, %s2674_s14  ;;  %v2267_v56 = vpop.f32.mrb[15].mxu1  ;;  %s2565_s14 = scalar_lea.vmem %s2564_s18, 256 }
 0x613   : > { %p2567_p5 = scmp.lt.s32.totalorder %s2565_s14, %s2559_s30 }
 0x615   : > { %v1709_v57 = vpop.f32.mrb[16].mxu1  ;;  %p2568_p9 = por %p2567_p5, %p2566_p3 }
 0x616   : > { %1714 = vrot.lane.b32.xlu1 %v1709_v57, %s2675_s20  ;;  %v2277_v58 = vpop.f32.mrb[17].mxu1 }
 0x617   : > { %p2569_p11 = pnand %p2568_p9, %p2562_p10 }
 0x619   : > { %v1880_v59 = vpop.f32.mrb[18].mxu1 }
 0x61a   : > { %1885 = vrot.lane.b32.xlu0 %v1880_v59, %s2676_s27  ;;  %v2287_v60 = vpop.f32.mrb[19].mxu1 }
 0x647   : > { %v860_v61 = vpop.permute.xlu0 %859 }
 0x648   : > { %863 = vst.msk [vmem:[#allocation2] sm:$0xff] %vm862_vm4, %v860_v61 }
 0x64b   : > { %v1031_v62 = vpop.permute.xlu1 %1030 }
 0x64c   : > { %1034 = vst.msk [vmem:[#allocation2] sm:$0xff] %vm1033_vm5, %v1031_v62 }
 0x64f   : > { %v1202_v21 = vpop.permute.xlu0 %1201 }
 0x650   : > { %1205 = vst.msk [vmem:[#allocation2] sm:$0xff] %vm1204_vm6, %v1202_v21 }
 0x653   : > { %v1373_v63 = vpop.permute.xlu1 %1372 }
 0x654   : > { %1376 = vst.msk [vmem:[#allocation2] sm:$0xff] %vm1375_vm7, %v1373_v63 }
 0x684   : > { %v1544_v1 = vpop.permute.xlu0 %1543 }
 0x685   : > { %1547 = vst.msk [vmem:[#allocation2] sm:$0xff] %vm1546_vm8, %v1544_v1 }
 0x688   : > { %v1715_v2 = vpop.permute.xlu1 %1714 }
 0x689   : > { %1718 = vst.msk [vmem:[#allocation2] sm:$0xff] %vm1717_vm9, %v1715_v2 }
 0x68c   : > { %v1886_v3 = vpop.permute.xlu0 %1885 }
 0x68d   : > { %1889 = vst.msk [vmem:[#allocation2] sm:$0xff] %vm1888_vm10, %v1886_v3 }
 0x694   : > { %v1890_v4 = vld [vmem:[#allocation2] sm:$0xff] }
 0x695   : > { %2297 = vmatmul.mubr.msk.f32.vlgmr.msra.gmra.mrb[16].mxu0 %vm318_vm0, %v1890_v4 }
 0x768   : > { %v1971_v6 = vpop.f32.mrb[16].mxu0 }
 0x769   : > { %v1972_v7 = vadd.f32 %v2133_v5, %v1971_v6  ;;  %v2298_v8 = vpop.f32.mrb[17].mxu0 }
 0x76b   : > { %v1975_v9 = vadd.f32 %v1972_v7, %v2912_v0 }
 0x76d   : > { %1976 = vst.msk [vmem:[%s309_s9] sm:$0xff] %vm318_vm0, %v1975_v9 }
 0x76e   : > { %2572 = shalt.err (!%p2569_p11)
}
 0x76f   : > { %s2573_s17 = scalar_lea.hbm %s3089_s19, 128  ;;  %s2577_s29 = scalar_lea.hbm %s3145_s6, 256 }
 0x770   : > { %p2574_p0 = scmp.ne.s32.totalorder %s3089_s19, %s2573_s17  ;;  %p2578_p6 = scmp.lt.u32.totalorder %s3089_s19, %s3145_s6 }
 0x771   : > { %p2579_p7 = scmp.lt.u32.totalorder %s2577_s29, %s2573_s17  ;;  %p2581_p8 = scmp.lt.u32.totalorder %s2573_s17, %s3089_s19 }
 0x772   : > { %p2575_p4 = pnand %p2574_p0, %p3162_p12 }
 0x773   : > { %p2580_p2 = por %p2579_p7, %p2578_p6 }
 0x774   : > { %p2576_p13 = pneg %p2575_p4 }
 0x775   : > { %p2582_p1 = por %p2581_p8, %p2580_p2 }
 0x777   : > { %p2583_p10 = pnand %p2582_p1, %p2576_p13 }
 0x779   : > { %2586 = shalt.err (!%p2583_p10)
}
 0x77a   : > { %2327 = dma.vmem_to_hbm [thread:$0]  (%p3162_p12), %s3091_s11, 128, %s3089_s19, %s1978_s24  }
 0x77b PF: > { %s3163_s9 = sld [smem:[#allocation13_spill]]  ;;  %s2004_s8 = sand.u32 1, %s2625_s21  }
 0x77c   : > { %p3165_p5 = scmp.ge.s32.totalorder %s2645_s26, 2  ;;  %s2005_s15 = scalar_lea.sflag [#allocation5], %s2004_s8 }
 0x781   : > { %p3164_p3 = scmp.ne.s32.totalorder %s3163_s9, 0 }
 0x783   : > { %p2341_p9 = pnand %p3165_p5, %p3164_p3 }
 0x785   : > { %2620 = dma.done.wait (!%p2341_p9), %s2005_s15, 128  }
 0x786   : > { %2622 = vsyncadd (!%p2341_p9), %s2005_s15, 4294967168  ;;  %s23_s26 = sadd.s32 1, %s2645_s26   ;;  %s3166_s21 = smov %s2629_s22 }
 0x787   : > { %p20_p11 = scmp.ge.s32.totalorder %s23_s26, 4   ;;  %s3167_s22 = smov %s2633_s23 }
 0x788   : > { %s3168_s23 = smov %s2855_s13  ;;  %s3169_s24 = smov %s2641_s25 }
 0x789   : > { %s3170_s25 = smov %s3172_s16  ;;  %22 = sbr.rel (!%p20_p11) target bundleno = 7 (0x7), region = 98 }
 0x790   :  { %2010 = vsyncpa [#allocation4], 1 }
 0x791   :  { %2012 = vsyncpa [#allocation4 + $0x1], 1 }
 0x792   :  { %2013 = vsyncpa [#allocation7], 1 }
 0x793   :  { %2014 = vsyncpa [#allocation5], 1 }
 0x794   :  { %2016 = vsyncpa [#allocation5 + $0x1], 1 }

// kernel: tpu_custom_call.1
= control target key start
LH: loop header
LB: loop body
LE: loop exit
PB: predicated region body
PF: predicated region fallthrough
CT: control target
= control target key end

     0   :  { %11 = vsyncpa [#allocation4], 0  ;;  %s3139_s0 = inlined_call_operand.hbm [shape: f32[2,8,32], index: 0, kind: input, shape index: {}]   ;;  %s3140_s1 = inlined_call_operand.vmem [shape: f32[1,32], index: 1, kind: input, shape index: {}]   ;;  %s3141_s2 = inlined_call_operand.vmem [shape: f32[1,32], index: 2, kind: input, shape index: {}]   ;;  %s3142_s3 = inlined_call_operand.hbm [shape: f32[32,96], index: 3, kind: input, shape index: {}]   ;;  %s3143_s4 = inlined_call_operand.hbm [shape: f32[32,32], index: 4, kind: input, shape index: {}]   ;;  %s3144_s5 = inlined_call_operand.vmem [shape: f32[1,32], index: 5, kind: input, shape index: {}]   ;;  %s3145_s6 = inlined_call_operand.hbm [shape: f32[2,8,32], index: 6, kind: output, shape index: {}]  }
   0x1   :  { %13 = vsyncpa [#allocation4 + $0x1], 0 }
   0x2   :  { %14 = vsyncpa [#allocation7], 0 }
   0x3   :  { %15 = vsyncpa [#allocation5], 0 }
   0x4   :  { %17 = vsyncpa [#allocation5 + $0x1], 0  ;;  %s2713_s21 = smov 0   ;;  %s2715_s22 = smov 0  }
   0x5   :  { %s2717_s23 = smov 0   ;;  %s2719_s24 = smov 0  }
   0x6   :  { %s2721_s25 = smov 0   ;;  %s2723_s26 = smov 0  }
   0x7 LB: > { %s2092_s27 = sadd.s32 4294967295, %s2645_s26   ;;  %s2093_s28 = sadd.s32 4294967294, %s2645_s26   ;;  %s2645_s26 = sphi %s2723_s26, %s23_s26   ;;  %s2641_s25 = sphi %s2721_s25, %s3170_s25   ;;  %s2637_s24 = sphi %s2719_s24, %s3169_s24   ;;  %s2633_s23 = sphi %s2717_s23, %s3168_s23   ;;  %s2629_s22 = sphi %s2715_s22, %s3167_s22   ;;  %s2625_s21 = sphi %s2713_s21, %s3166_s21  }
   0x8   : > { %p55_p0 = scmp.ne.s32.totalorder %s2629_s22, %s2625_s21  ;;  %p2747_p1 = scmp.eq.s32.totalorder %s2092_s27, 0 }
   0x9   : > { %p2751_p2 = scmp.eq.s32.totalorder %s2092_s27, 1  ;;  %p192_p3 = scmp.eq.s32.totalorder %s2093_s28, 1 }
   0xa   : > { %s3151_s29 = scalar_select %p2747_p1, 1, 0 }
   0xb   : > { %p2757_p4 = por %p2747_p1, %p55_p0  ;;  %p2094_p5 = scmp.ge.s32.totalorder %s2645_s26, 1 }
   0xc   : > { %p2762_p6 = por %p192_p3, %p55_p0  ;;  %p199_p7 = scmp.lt.s32.totalorder %s2645_s26, 3 }
   0xd   : > { %s3153_s7 = scalar_select %p2757_p4, 1, 0 }
   0xe   : > { %s3154_s8 = scalar_select %p2762_p6, 1, 0 }
   0xf   : > { %p2767_p8 = pnand %p2094_p5, %p199_p7  ;;  %s2647_s10 = smov [#allocation6]  }
  0x10   : > { %3155 = sst [smem:[#allocation13_spill]] %s3154_s8  ;;  %s217_s11 = sshll.u32 %s2647_s10, 4  ;;  %s2771_s11 = int_to_ptr.vmem [resolvable:$true] %s217_s11 }
  0x11   : > { %p2329_p9 = pneg %p2767_p8  ;;  %s2648_s13 = smov [#allocation8]  }
  0x12   : > { %s230_s14 = sshll.u32 %s2648_s13, 4  ;;  %s2473_s17 = scalar_lea.hbm %s3142_s3, 512  ;;  %s2782_s14 = int_to_ptr.vmem [resolvable:$true] %s230_s14 }
  0x13   : > { %p2778_p11 = pnand %p2329_p9, %p2747_p1  ;;  %p2474_p12 = scmp.ne.s32.totalorder %s3142_s3, %s2473_s17 }
  0x14   : > { %p2480_p5 = scmp.lt.u32.totalorder %s2473_s17, %s3142_s3 }
  0x15   : > { %p2475_p13 = pneg %p2778_p11 }
  0x17   : > { %p2476_p0 = pnand %p2475_p13, %p2474_p12 }
  0x19   : > { %p2477_p3 = pneg %p2476_p0 }
  0x1b   : > { %p2482_p7 = pnand %p2480_p5, %p2477_p3 }
  0x1d   : > { %2485 = shalt.err (!%p2482_p7)
}
  0x1e   : > { %s2486_s28 = scalar_lea.vmem %s2771_s11, 512  ;;  %p2494_p1 = scmp.lt.s32.totalorder %s2771_s11, %s2771_s11 }
  0x1f   : > { %p2487_p9 = scmp.ne.s32.totalorder %s2771_s11, %s2486_s28  ;;  %p2495_p12 = scmp.lt.s32.totalorder %s2486_s28, %s2486_s28 }
  0x21   : > { %p2489_p10 = pnand %p2487_p9, %p2475_p13  ;;  %p2496_p0 = por %p2495_p12, %p2494_p1 }
  0x23   : > { %p2490_p6 = pneg %p2489_p10 }
  0x25   : > { %p2497_p4 = pnand %p2496_p0, %p2490_p6 }
  0x27   : > { %2500 = shalt.err (!%p2497_p4)
}
  0x28   : > { %s2649_s10 = smov 128   ;;  %s2650_s13 = smov 8  }
  0x29   : > { %2332 = dma.hbm_to_vmem [thread:$0]  (!%p2778_p11), %s3142_s3, 512, %s2771_s11, [#allocation7], %s2649_s10, %s2649_s10, %s2650_s13  }
  0x2a   : > { %s2501_s19 = scalar_lea.hbm %s3143_s4, 512 }
  0x2b   : > { %p2502_p1 = scmp.ne.s32.totalorder %s3143_s4, %s2501_s19  ;;  %p2508_p10 = scmp.lt.u32.totalorder %s2501_s19, %s3143_s4 }
  0x2d   : > { %p2504_p4 = pnand %p2502_p1, %p2475_p13 }
  0x2f   : > { %p2505_p6 = pneg %p2504_p4 }
  0x31   : > { %p2510_p3 = pnand %p2508_p10, %p2505_p6 }
  0x33   : > { %2513 = shalt.err (!%p2510_p3)
}
  0x34   : > { %s2514_s11 = scalar_lea.vmem %s2782_s14, 512  ;;  %p2522_p12 = scmp.lt.s32.totalorder %s2782_s14, %s2782_s14 }
  0x35   : > { %p2515_p5 = scmp.ne.s32.totalorder %s2782_s14, %s2514_s11  ;;  %p2523_p0 = scmp.lt.s32.totalorder %s2514_s11, %s2514_s11 }
  0x37   : > { %p2517_p7 = pnand %p2515_p5, %p2475_p13  ;;  %p2524_p1 = por %p2523_p0, %p2522_p12 }
  0x39   : > { %p2518_p9 = pneg %p2517_p7 }
  0x3b   : > { %p2525_p4 = pnand %p2524_p1, %p2518_p9 }
  0x3d   : > { %2528 = shalt.err (!%p2525_p4)
}
  0x3e   : > { %2335 = dma.hbm_to_vmem [thread:$0]  (!%p2778_p11), %s3143_s4, 512, %s2782_s14, [#allocation7], %s2649_s10, %s2649_s10, %s2650_s13  }
  0x3f   : > { %s35_s16 = sadd.s32 1, %s2641_s25  ;;  %s42_s17 = sadd.s32 1, %s2633_s23 }
  0x40   : > { %p37_p13 = scmp.ge.s32.totalorder %s35_s16, 2  ;;  %p49_p6 = scmp.ne.s32.totalorder %s2633_s23, %s2629_s22 }
  0x41   : > { %p50_p10 = scmp.eq.s32.totalorder %s2645_s26, 0  ;;  %p2346_p3 = scmp.lt.s32.totalorder %s2645_s26, 2 }
  0x42   : > { %s3172_s16 = smov (%p37_p13, %s35_s16), 0  ;;  %p2846_p7 = por %p2751_p2, %p49_p6 }
  0x43   : > { %p51_p5 = por %p50_p10, %p49_p6  ;;  %s39_s18 = ssub.s32 %s2641_s25, %s3172_s16 }
  0x44   : > { %s3158_s12 = scalar_select %p2846_p7, 1, 0 }
  0x45   : > { %s247_s19 = sand.u32 1, %s2633_s23   ;;  %p40_p9 = scmp.eq.s32.totalorder %s39_s18, 0 }
  0x46   : > { %s2098_s14 = sshll.u32 %s247_s19, 3  ;;  %s2099_s10 = sshll.u32 %s2641_s25, 7 }
  0x47   : > { %s2855_s13 = scalar_select %p40_p9, %s2633_s23, %s42_s17  }
  0x48   : > { %s2860_s28 = scalar_lea.hbm %s3139_s0, %s2099_s10  ;;  %s251_s30 = scalar_lea.vmem [#allocation3], %s2098_s14 }
  0x49   : > { %s258_s11 = sshll.u32 %s251_s30, 4  ;;  %p2864_p2 = pnand %p2346_p3, %p51_p5  ;;  %s2868_s11 = int_to_ptr.vmem [resolvable:$true] %s258_s11 }
  0x4a   : > { %s248_s15 = scalar_lea.sflag [#allocation4], %s247_s19  ;;  %s2529_s17 = scalar_lea.hbm %s2860_s28, 128 }
  0x4b   : > { %p2530_p11 = scmp.ne.s32.totalorder %s2860_s28, %s2529_s17  ;;  %p2531_p12 = pneg %p2864_p2 }
  0x4c   : > { %s2534_s10 = scalar_lea.hbm %s3139_s0, 256  ;;  %p2535_p4 = scmp.lt.u32.totalorder %s2860_s28, %s3139_s0 }
  0x4d   : > { %p2532_p0 = pnand %p2531_p12, %p2530_p11  ;;  %p2536_p13 = scmp.lt.u32.totalorder %s2534_s10, %s2529_s17 }
  0x4e   : > { %p2538_p10 = scmp.lt.u32.totalorder %s2529_s17, %s2860_s28 }
  0x4f   : > { %p2533_p1 = pneg %p2532_p0  ;;  %p2537_p6 = por %p2536_p13, %p2535_p4 }
  0x51   : > { %p2539_p3 = por %p2538_p10, %p2537_p6 }
  0x53   : > { %p2540_p5 = pnand %p2539_p3, %p2533_p1 }
  0x55   : > { %2543 = shalt.err (!%p2540_p5)
}
  0x56   : > { %s2544_s19 = scalar_lea.vmem %s2868_s11, 128  ;;  %s2651_s30 = smov [#allocation3]  }
  0x57   : > { %p2545_p9 = scmp.ne.s32.totalorder %s2868_s11, %s2544_s19  ;;  %s2549_s18 = sshll.u32 %s2651_s30, 4  ;;  %s2550_s18 = int_to_ptr.vmem [resolvable:$false] %s2549_s18 }
  0x58   : > { %s2551_s14 = scalar_lea.vmem %s2550_s18, 256  ;;  %p2552_p7 = scmp.lt.s32.totalorder %s2868_s11, %s2550_s18 }
  0x59   : > { %p2547_p11 = pnand %p2545_p9, %p2531_p12  ;;  %p2553_p4 = scmp.lt.s32.totalorder %s2551_s14, %s2544_s19 }
  0x5b   : > { %p2548_p0 = pneg %p2547_p11  ;;  %p2554_p13 = por %p2553_p4, %p2552_p7 }
  0x5d   : > { %p2555_p6 = pnand %p2554_p13, %p2548_p0 }
  0x5f   : > { %2558 = shalt.err (!%p2555_p6)
}
  0x60   : > { %2339 = dma.hbm_to_vmem [thread:$0]  (!%p2864_p2), %s2860_s28, 128, %s2868_s11, %s248_s15  }
  0x61   : > { %267 = sbr.rel (%p2767_p8) target bundleno = 1915 (0x77b), region = 44  ;;  %s2898_s17 = sand.u32 (!%p2767_p8), 1, %s2629_s22  }
  0x62   : > { %s2101_s10 = sshll.u32 (!%p2767_p8), %s2898_s17, 3  ;;  %s270_s20 = scalar_lea.sflag (!%p2767_p8), [#allocation4], %s2898_s17 }
  0x63   : > { %s273_s27 = scalar_lea.vmem (!%p2767_p8), [#allocation3], %s2101_s10  ;;  %p3160_p7 = scmp.ne.s32.totalorder (!%p2767_p8), %s3153_s7, 0 }
  0x68   : > { %2612 = dma.done.wait (%p3160_p7), %s270_s20, 128  }
  0x69   : > { %2614 = vsyncadd (%p3160_p7), %s270_s20, 4294967168  ;;  %p3161_p2 = scmp.ne.s32.totalorder %s3151_s29, 0 }
  0x6b   : > { %2616 = dma.done.wait (%p3161_p2), [#allocation7], 1024  }
  0x6c   : > { %2618 = vsyncadd (%p3161_p2), [#allocation7], 4294966272  ;;  %vm318_vm0 = vcmask 261120   ;;  %v2912_v0 = vld [vmem:[%s273_s27] sm:$0xff]  ;;  %v313_v2 = vld [vmem:[#allocation6] sm:$0xff]  ;;  %s2652_s9 = smov 96  }
  0x6d   : > { %v319_v1 = vsel %vm318_vm0, %v2912_v0, 0.0  ;;  %v314_v3 = vld [vmem:[#allocation6 + $0x8] sm:$0xff]  ;;  %v315_v15 = vld [vmem:[#allocation6 + $0x10] sm:$0xff]  ;;  %v316_v16 = vld [vmem:[#allocation6 + $0x18] sm:$0xff]  ;;  %v2653_v21 = vmov 0.0|0.0   ;;  %vm2654_vm1 = vmmov 0  }
  0x6e   : > { %320 = vadd.xlane.f32.xlu0 %v319_v1  ;;  %v2427_v4 = vpack.i.bf16 %v314_v3, %v313_v2  ;;  %v2432_v17 = vpack.i.bf16 %v316_v16, %v315_v15  ;;  %2299 = vmatprep.subr.bf16.mxu0 %v2653_v21  ;;  %v2306_v23 = vpack.c.bf16 %v314_v3, %v313_v2  ;;  %v2655_v24 = vmov 0.0   ;;  %v2105_v37 = vld [vmem:[%s3140_s1] ss:$0 sm:$0xff]  ;;  %s2656_s8 = smov 120   ;;  %s2657_s15 = smov 124  }
  0x6f   : > { %2305 = vmatprep.subr.bf16.mxu1 %v2653_v21  ;;  %2194 = vmatprep.mubr.msk.f32.mxu0 %vm2654_vm1, %v2655_v24  ;;  %v2309_v25 = vpack.c.bf16 %v316_v16, %v315_v15  ;;  %v2106_v39 = vld [vmem:[%s3141_s2] ss:$0 sm:$0xff]  ;;  %vm527_vm2 = vcmask 31744   ;;  %s2658_s19 = smov 116   ;;  %s2659_s30 = smov 112   ;;  %vm604_vm3 = vcmask 64512  }
  0x70   : > { %2307 = vmatpush3.bf16.msra.mxu1 %v2306_v23  ;;  %2205 = vmatprep.mubr.msk.f32.mxu1 %vm2654_vm1, %v2655_v24  ;;  %s2660_s18 = smov 108   ;;  %s2661_s14 = smov 104   ;;  %vm862_vm4 = vcmask 64544   ;;  %vm1033_vm5 = vcmask 97344   ;;  %vm1204_vm6 = vcmask 130144   ;;  %vm1375_vm7 = vcmask 162944  }
  0x71   : > { %2308 = vmatprep.subr.bf16.mxu1 %v2653_v21  ;;  %s2662_s20 = smov 100   ;;  %s2663_s27 = smov 92   ;;  %vm1546_vm8 = vcmask 195744   ;;  %vm1717_vm9 = vcmask 228544   ;;  %vm1888_vm10 = vcmask 261344  }
  0x72   : > { %439 = vadd.xlane.f32.xlu0 %v319_v1  ;;  %s2664_s29 = smov 88   ;;  %s2665_s7 = smov 84  }
  0x73   : > { %s2666_s28 = smov 80   ;;  %s2668_s11 = smov 68  }
  0x74   : > { %2310 = vmatpush3.bf16.msra.mxu1 %v2309_v25  ;;  %p3162_p12 = scmp.ne.s32.totalorder %s3158_s12, 0 }
  0x75   : > { %2208 = vmatprep.subr.mxu1 %v2655_v24 }
  0x88   : > { %2428 = vrot.lane.b32.xlu0 %v2427_v4, %s2652_s9 }
  0xfb   : > { %v321_v5 = vpop.xlane.xlu0 %320 }
  0xfc   : > { %v323_v6 = vmul.f32 0.03125, %v321_v5 }
  0xfe   : > { %v324_v7 = vsub.f32 %v2912_v0, %v323_v6 }
  0xff   : > { %v440_v8 = vpop.xlane.xlu0 %439 }
 0x100   : > { %v441_v9 = vmul.f32 0.03125, %v440_v8  ;;  %v325_v10 = vmul.f32 %v324_v7, %v324_v7 }
 0x102   : > { %v442_v11 = vsub.f32 %v2912_v0, %v441_v9  ;;  %v326_v12 = vsel %vm318_vm0, %v325_v10, 0.0 }
 0x103   : > { %327 = vadd.xlane.f32.xlu1 %v326_v12  ;;  %v2429_v18 = vpop.permute.xlu0 %2428 }
 0x104   : > { %v443_v13 = vmul.f32 %v442_v11, %v442_v11  ;;  %v2431_v19 = vunpack.i.h.bf16 %v2429_v18  ;;  %v2430_v20 = vunpack.i.l.bf16 %v2429_v18 }
 0x106   : > { %v444_v14 = vsel %vm318_vm0, %v443_v13, 0.0  ;;  %v2300_v22 = vpack.c.bf16 %v2431_v19, %v2430_v20 }
 0x107   : > { %445 = vadd.xlane.f32.xlu1 %v444_v14 }
 0x108   : > { %2301 = vmatpush3.bf16.msra.mxu0 %v2300_v22 }
 0x109   : > { %2302 = vmatprep.subr.bf16.mxu0 %v2653_v21 }
 0x118   : > { %2433 = vrot.lane.b32.xlu1 %v2432_v17, %s2652_s9 }
 0x190   : > { %v328_v26 = vpop.xlane.xlu1 %327 }
 0x191   : > { %v329_v27 = vmul.f32 0.03125, %v328_v26 }
 0x193   : > { %v330_v28 = vadd.f32 1e-05, %v329_v27 }
 0x194   : > { %v446_v29 = vpop.xlane.xlu1 %445 }
 0x195   : > { %2437 = vrsqrt.f32 %v330_v28  ;;  %v447_v30 = vmul.f32 0.03125, %v446_v29 }
 0x197   : > { %v448_v31 = vadd.f32 1e-05, %v447_v30 }
 0x198   : > { %v2434_v32 = vpop.permute.xlu1 %2433 }
 0x199   : > { %2439 = vrsqrt.f32 %v448_v31  ;;  %v2436_v33 = vunpack.i.h.bf16 %v2434_v32  ;;  %v2435_v34 = vunpack.i.l.bf16 %v2434_v32 }
 0x19b   : > { %v2303_v35 = vpack.c.bf16 %v2436_v33, %v2435_v34 }
 0x19d   : > { %2304 = vmatpush3.bf16.msra.mxu0 %v2303_v35 }
 0x19e   : > { %2218 = vmatprep.subr.mxu0 %v2655_v24 }
 0x19f   : > { %v2438_v36 = vpop.eup %2437 }
 0x1a0   : > { %v332_v38 = vmul.f32 %v2438_v36, %v324_v7 }
 0x1a2   : > { %v339_v40 = vmul.f32 %v2105_v37, %v332_v38 }
 0x1a3   : > { %v2440_v41 = vpop.eup %2439 }
 0x1a4   : > { %v346_v42 = vadd.f32 %v2106_v39, %v339_v40  ;;  %v450_v43 = vmul.f32 %v2440_v41, %v442_v11 }
 0x1a6   : > { %2195 = vmatmul.mubr.msk.f32.vlgmr.msra.gmra.mrb[0].mxu0 %vm318_vm0, %v346_v42  ;;  %v451_v44 = vmul.f32 %v2105_v37, %v450_v43 }
 0x1a7   : > { %2220 = vmatprep.mubr.msk.f32.mxu0 %vm2654_vm1, %v2655_v24 }
 0x1a8   : > { %v452_v45 = vadd.f32 %v2106_v39, %v451_v44 }
 0x1aa   : > { %v453_v46 = vmul.f32 0.5, %v452_v45 }
 0x1ac   : > { %2206 = vmatmul.mubr.msk.f32.vlgmr.msra.gmra.mrb[0].mxu1 %vm318_vm0, %v453_v46 }
 0x1ad   : > { %2210 = vmatprep.mubr.msk.f32.mxu1 %vm2654_vm1, %v2655_v24 }
 0x279   : > { %v2944_v47 = vpop.f32.mrb[0].mxu0 }
 0x27a   : > { %866 = vrot.lane.b32.xlu0 %v2944_v47, %s2656_s8  ;;  %695 = vrot.lane.b32.xlu1 %v2944_v47, %s2657_s15  ;;  %v2196_v48 = vpop.f32.mrb[1].mxu0 }
 0x27b   : > { %2209 = vmatpush3.xpose.msk.msra.mxu1 %vm527_vm2, %v2944_v47 }
 0x27c   : > { %2213 = vmatprep.subr.mxu1 %v2655_v24 }
 0x27e   : > { %1037 = vrot.lane.b32.xlu0 %v2944_v47, %s2658_s19 }
 0x27f   : > { %v523_v49 = vpop.f32.mrb[0].mxu1 }
 0x280   : > { %v2207_v50 = vpop.f32.mrb[1].mxu1  ;;  %693 = vrot.lane.b32.xlu1 %v523_v49, %s2657_s15  ;;  %2211 = vmatmul.mubr.msk.f32.vlgmr.msra.gmra.mrb[2].mxu1 %vm527_vm2, %v523_v49  ;;  %s2670_s15 = smov 4  }
 0x281   : > { %2215 = vmatprep.mubr.msk.f32.mxu1 %vm2654_vm1, %v2655_v24 }
 0x282   : > { %1208 = vrot.lane.b32.xlu0 %v2944_v47, %s2659_s30 }
 0x284   : > { %864 = vrot.lane.b32.xlu1 %v523_v49, %s2656_s8  ;;  %s2669_s8 = smov 72  }
 0x286   : > { %1379 = vrot.lane.b32.xlu0 %v2944_v47, %s2660_s18 }
 0x288   : > { %1035 = vrot.lane.b32.xlu1 %v523_v49, %s2658_s19  ;;  %s2671_s19 = smov 8  }
 0x28a   : > { %1550 = vrot.lane.b32.xlu0 %v2944_v47, %s2661_s14 }
 0x28c   : > { %1206 = vrot.lane.b32.xlu1 %v523_v49, %s2659_s30  ;;  %s2672_s30 = smov 12  }
 0x28e   : > { %1721 = vrot.lane.b32.xlu0 %v2944_v47, %s2662_s20 }
 0x290   : > { %1377 = vrot.lane.b32.xlu1 %v523_v49, %s2660_s18  ;;  %s2673_s18 = smov 16  }
 0x294   : > { %1548 = vrot.lane.b32.xlu1 %v523_v49, %s2661_s14  ;;  %s2674_s14 = smov 20  }
 0x298   : > { %1719 = vrot.lane.b32.xlu1 %v523_v49, %s2662_s20  ;;  %s2675_s20 = smov 24  }
 0x2ec   : > { %v867_v51 = vpop.permute.xlu0 %866  ;;  %v696_v52 = vpop.permute.xlu1 %695 }
 0x2ed   : > { %2219 = vmatpush3.xpose.msk.msra.mxu0 %vm527_vm2, %v696_v52 }
 0x2ee   : > { %2228 = vmatprep.subr.mxu0 %v2655_v24 }
 0x2f0   : > { %v1038_v53 = vpop.permute.xlu0 %1037 }
 0x2f2   : > { %v694_v54 = vpop.permute.xlu1 %693 }
 0x2f3   : > { %2221 = vmatmul.mubr.msk.f32.vlgmr.msra.gmra.mrb[2].mxu0 %vm527_vm2, %v694_v54 }
 0x2f4   : > { %2229 = vmatpush3.xpose.msk.msra.mxu0 %vm527_vm2, %v867_v51  ;;  %2230 = vmatprep.mubr.msk.f32.mxu0 %vm2654_vm1, %v2655_v24  ;;  %v1209_v55 = vpop.permute.xlu0 %1208 }
 0x2f5   : > { %2238 = vmatprep.subr.mxu0 %v2655_v24 }
 0x2f6   : > { %v865_v56 = vpop.permute.xlu1 %864 }
 0x2f7   : > { %2231 = vmatmul.mubr.msk.f32.vlgmr.msra.gmra.mrb[4].mxu0 %vm527_vm2, %v865_v56 }
 0x2f8   : > { %2239 = vmatpush3.xpose.msk.msra.mxu0 %vm527_vm2, %v1038_v53  ;;  %2240 = vmatprep.mubr.msk.f32.mxu0 %vm2654_vm1, %v2655_v24  ;;  %v1380_v58 = vpop.permute.xlu0 %1379 }
 0x2f9   : > { %2248 = vmatprep.subr.mxu0 %v2655_v24 }
 0x2fa   : > { %v1036_v57 = vpop.permute.xlu1 %1035 }
 0x2fb   : > { %2241 = vmatmul.mubr.msk.f32.vlgmr.msra.gmra.mrb[6].mxu0 %vm527_vm2, %v1036_v57 }
 0x2fc   : > { %2249 = vmatpush3.xpose.msk.msra.mxu0 %vm527_vm2, %v1209_v55  ;;  %2250 = vmatprep.mubr.msk.f32.mxu0 %vm2654_vm1, %v2655_v24  ;;  %v1551_v60 = vpop.permute.xlu0 %1550 }
 0x2fd   : > { %2258 = vmatprep.subr.mxu0 %v2655_v24 }
 0x2fe   : > { %v1207_v59 = vpop.permute.xlu1 %1206 }
 0x2ff   : > { %2251 = vmatmul.mubr.msk.f32.vlgmr.msra.gmra.mrb[8].mxu0 %vm527_vm2, %v1207_v59 }
 0x300   : > { %2259 = vmatpush3.xpose.msk.msra.mxu0 %vm527_vm2, %v1380_v58  ;;  %2260 = vmatprep.mubr.msk.f32.mxu0 %vm2654_vm1, %v2655_v24  ;;  %v1722_v63 = vpop.permute.xlu0 %1721 }
 0x301   : > { %2268 = vmatprep.subr.mxu0 %v2655_v24 }
 0x302   : > { %v1378_v61 = vpop.permute.xlu1 %1377 }
 0x303   : > { %2261 = vmatmul.mubr.msk.f32.vlgmr.msra.gmra.mrb[10].mxu0 %vm527_vm2, %v1378_v61 }
 0x304   : > { %2269 = vmatpush3.xpose.msk.msra.mxu0 %vm527_vm2, %v1551_v60  ;;  %2270 = vmatprep.mubr.msk.f32.mxu0 %vm2654_vm1, %v2655_v24 }
 0x305   : > { %2278 = vmatprep.subr.mxu0 %v2655_v24 }
 0x306   : > { %v1549_v62 = vpop.permute.xlu1 %1548 }
 0x307   : > { %2271 = vmatmul.mubr.msk.f32.vlgmr.msra.gmra.mrb[12].mxu0 %vm527_vm2, %v1549_v62 }
 0x308   : > { %2279 = vmatpush3.xpose.msk.msra.mxu0 %vm527_vm2, %v1722_v63  ;;  %2280 = vmatprep.mubr.msk.f32.mxu0 %vm2654_vm1, %v2655_v24 }
 0x309   : > { %2311 = vmatprep.subr.bf16.mxu0 %v2653_v21 }
 0x30a   : > { %v1720_v1 = vpop.permute.xlu1 %1719 }
 0x30b   : > { %2281 = vmatmul.mubr.msk.f32.vlgmr.msra.gmra.mrb[14].mxu0 %vm527_vm2, %v1720_v1 }
 0x30c   : > { %2296 = vmatprep.mubr.msk.f32.mxu0 %vm2654_vm1, %v2655_v24 }
 0x353   : > { %v600_v2 = vpop.f32.mrb[2].mxu1 }
 0x354   : > { %v2212_v3 = vpop.f32.mrb[3].mxu1  ;;  %v605_v4 = vsel %vm604_vm3, %v600_v2, -inf }
 0x355   : > { %606 = vmax.xlane.f32.xlu0 %v605_v4 }
 0x3c6   : > { %v767_v5 = vpop.f32.mrb[2].mxu0 }
 0x3c7   : > { %v2222_v6 = vpop.f32.mrb[3].mxu0  ;;  %v771_v7 = vsel %vm604_vm3, %v767_v5, -inf }
 0x3c8   : > { %772 = vmax.xlane.f32.xlu1 %v771_v7 }
 0x3ca   : > { %v938_v8 = vpop.f32.mrb[4].mxu0 }
 0x3cb   : > { %v2232_v9 = vpop.f32.mrb[5].mxu0  ;;  %v942_v10 = vsel %vm604_vm3, %v938_v8, -inf }
 0x3cc   : > { %943 = vmax.xlane.f32.xlu0 %v942_v10 }
 0x3ce   : > { %v1109_v11 = vpop.f32.mrb[6].mxu0 }
 0x3cf   : > { %v2242_v12 = vpop.f32.mrb[7].mxu0  ;;  %v1113_v13 = vsel %vm604_vm3, %v1109_v11, -inf }
 0x3d0   : > { %1114 = vmax.xlane.f32.xlu0 %v1113_v13 }
 0x3d2   : > { %v1280_v14 = vpop.f32.mrb[8].mxu0 }
 0x3d3   : > { %v2252_v15 = vpop.f32.mrb[9].mxu0  ;;  %v1284_v16 = vsel %vm604_vm3, %v1280_v14, -inf }
 0x3d4   : > { %1285 = vmax.xlane.f32.xlu0 %v1284_v16 }
 0x3d6   : > { %v2999_v17 = vpop.f32.mrb[10].mxu0 }
 0x3d7   : > { %v2262_v18 = vpop.f32.mrb[11].mxu0  ;;  %v1455_v19 = vsel %vm604_vm3, %v2999_v17, -inf }
 0x3d8   : > { %1456 = vmax.xlane.f32.xlu1 %v1455_v19 }
 0x3da   : > { %v1622_v20 = vpop.f32.mrb[12].mxu0 }
 0x3db   : > { %v2272_v22 = vpop.f32.mrb[13].mxu0  ;;  %v1626_v23 = vsel %vm604_vm3, %v1622_v20, -inf }
 0x3dc   : > { %1627 = vmax.xlane.f32.xlu0 %v1626_v23 }
 0x3de   : > { %v3004_v25 = vpop.f32.mrb[14].mxu0 }
 0x3df   : > { %v2282_v26 = vpop.f32.mrb[15].mxu0  ;;  %v1797_v32 = vsel %vm604_vm3, %v3004_v25, -inf }
 0x3e2   : > { %v607_v27 = vpop.xlane.xlu0 %606 }
 0x3e3   : > { %v608_v28 = vsub.f32 %v600_v2, %v607_v27 }
 0x3e5   : > { %v609_v29 = vmul.f32 1.442695, %v608_v28 }
 0x3e7   : > { %2441 = vpow2.f32 %v609_v29 }
 0x3e9   : > { %616 = vrot.lane.b32.xlu1 %v2944_v47, %s2652_s9  ;;  %s2667_s9 = smov 76  }
 0x3f1   : > { %v2442_v30 = vpop.eup %2441 }
 0x3f2   : > { %v611_v31 = vsel %vm604_vm3, %v2442_v30, 0.0 }
 0x3f3   : > { %612 = vadd.xlane.f32.xlu0 %v611_v31 }
 0x409   : > { %782 = vrot.lane.b32.xlu0 %v2944_v47, %s2663_s27  ;;  %s2676_s27 = smov 28  }
 0x40d   : > { %1798 = vmax.xlane.f32.xlu1 %v1797_v32 }
 0x41e   : > { %953 = vrot.lane.b32.xlu1 %v2944_v47, %s2664_s29 }
 0x422   : > { %1124 = vrot.lane.b32.xlu1 %v2944_v47, %s2665_s7 }
 0x426   : > { %1295 = vrot.lane.b32.xlu1 %v2944_v47, %s2666_s28  ;;  %s2136_s28 = sshll.u32 %s2637_s24, 7  ;;  %s1978_s24 = scalar_lea.sflag [#allocation5], %s2898_s17 }
 0x455   : > { %v773_v33 = vpop.xlane.xlu1 %772 }
 0x456   : > { %v774_v34 = vsub.f32 %v767_v5, %v773_v33 }
 0x458   : > { %v775_v35 = vmul.f32 1.442695, %v774_v34 }
 0x459   : > { %v944_v36 = vpop.xlane.xlu0 %943 }
 0x45a   : > { %2443 = vpow2.f32 %v775_v35  ;;  %v945_v37 = vsub.f32 %v938_v8, %v944_v36 }
 0x45c   : > { %v946_v38 = vmul.f32 1.442695, %v945_v37 }
 0x45d   : > { %v1115_v39 = vpop.xlane.xlu0 %1114 }
 0x45e   : > { %2445 = vpow2.f32 %v946_v38  ;;  %v1116_v40 = vsub.f32 %v1109_v11, %v1115_v39 }
 0x460   : > { %v1117_v41 = vmul.f32 1.442695, %v1116_v40 }
 0x461   : > { %v1286_v42 = vpop.xlane.xlu0 %1285 }
 0x462   : > { %2447 = vpow2.f32 %v1117_v41  ;;  %v1287_v43 = vsub.f32 %v1280_v14, %v1286_v42 }
 0x464   : > { %v3015_v44 = vpop.eup %2443  ;;  %v1288_v45 = vmul.f32 1.442695, %v1287_v43 }
 0x465   : > { %v1457_v46 = vpop.xlane.xlu1 %1456  ;;  %v777_v48 = vsel %vm604_vm3, %v3015_v44, 0.0 }
 0x466   : > { %2449 = vpow2.f32 %v1288_v45  ;;  %778 = vadd.xlane.f32.xlu1 %v777_v48  ;;  %v1458_v1 = vsub.f32 %v2999_v17, %v1457_v46 }
 0x468   : > { %v3019_v49 = vpop.eup %2445  ;;  %v1459_v3 = vmul.f32 1.442695, %v1458_v1 }
 0x469   : > { %v617_v50 = vpop.permute.xlu1 %616  ;;  %v1628_v51 = vpop.xlane.xlu0 %1627  ;;  %v948_v52 = vsel %vm604_vm3, %v3019_v49, 0.0 }
 0x46a   : > { %v1629_v53 = vsub.f32 %v1622_v20, %v1628_v51  ;;  %2214 = vmatpush3.msra.mxu1 %v617_v50  ;;  %949 = vadd.xlane.f32.xlu0 %v948_v52  ;;  %v1892_v50 = vld [vmem:[#allocation8 + $0x8] sm:$0xff]  ;;  %v1893_v52 = vld [vmem:[#allocation8 + $0x10] sm:$0xff] }
 0x46b   : > { %2223 = vmatprep.subr.mxu1 %v2655_v24 }
 0x46c   : > { %v2448_v54 = vpop.eup %2447  ;;  %v1630_v55 = vmul.f32 1.442695, %v1629_v53  ;;  %v1894_v53 = vld [vmem:[#allocation8 + $0x18] sm:$0xff] }
 0x46d   : > { %v1119_v56 = vsel %vm604_vm3, %v2448_v54, 0.0 }
 0x46e   : > { %2451 = vpow2.f32 %v1630_v55  ;;  %1120 = vadd.xlane.f32.xlu1 %v1119_v56 }
 0x470   : > { %v3025_v57 = vpop.eup %2449 }
 0x471   : > { %v1290_v58 = vsel %vm604_vm3, %v3025_v57, 0.0 }
 0x472   : > { %1291 = vadd.xlane.f32.xlu0 %v1290_v58 }
 0x478   : > { %v3029_v59 = vpop.eup %2451 }
 0x479   : > { %v1632_v60 = vsel %vm604_vm3, %v3029_v59, 0.0 }
 0x47a   : > { %1633 = vadd.xlane.f32.xlu0 %v1632_v60 }
 0x47f   : > { %1466 = vrot.lane.b32.xlu1 %v2944_v47, %s2667_s9  ;;  %s309_s9 = scalar_lea.vmem [#allocation9], %s2101_s10  ;;  %s2677_s10 = smov [#allocation9]  }
 0x480   : > { %v613_v61 = vpop.xlane.xlu0 %612 }
 0x481   : > { %2453 = vrcp.f32 %v613_v61 }
 0x482   : > { %2455 = vpow2.f32 %v1459_v3 }
 0x484   : > { %v783_v2 = vpop.permute.xlu0 %782 }
 0x48b   : > { %v2454_v62 = vpop.eup %2453 }
 0x48c   : > { %v615_v63 = vmul.f32 %v2454_v62, %v2442_v30  ;;  %v2456_v7 = vpop.eup %2455 }
 0x48d   : > { %v1461_v8 = vsel %vm604_vm3, %v2456_v7, 0.0 }
 0x48e   : > { %2216 = vmatmul.mubr.msk.f32.vlgmr.msra.gmra.mrb[4].mxu1 %vm604_vm3, %v615_v63 }
 0x48f   : > { %2224 = vmatpush3.msra.mxu1 %v783_v2  ;;  %2225 = vmatprep.mubr.msk.f32.mxu1 %vm2654_vm1, %v2655_v24 }
 0x490   : > { %2233 = vmatprep.subr.mxu1 %v2655_v24 }
 0x49a   : > { %v1799_v4 = vpop.xlane.xlu1 %1798 }
 0x49b   : > { %v1800_v5 = vsub.f32 %v3004_v25, %v1799_v4 }
 0x49d   : > { %v1801_v6 = vmul.f32 1.442695, %v1800_v5  ;;  %v2133_v5 = vld [vmem:[%s3144_s5] ss:$0 sm:$0xff] }
 0x49e   : > { %v954_v11 = vpop.permute.xlu1 %953 }
 0x49f   : > { %2457 = vpow2.f32 %v1801_v6 }
 0x4a2   : > { %v1125_v12 = vpop.permute.xlu1 %1124 }
 0x4a3   : > { %1462 = vadd.xlane.f32.xlu1 %v1461_v8 }
 0x4a6   : > { %v1296_v13 = vpop.permute.xlu1 %1295 }
 0x4a9   : > { %v3041_v9 = vpop.eup %2457 }
 0x4aa   : > { %v1803_v10 = vsel %vm604_vm3, %v3041_v9, 0.0 }
 0x4ab   : > { %1804 = vadd.xlane.f32.xlu0 %v1803_v10 }
 0x4b4   : > { %1808 = vrot.lane.b32.xlu1 %v2944_v47, %s2668_s11  ;;  %s1992_s11 = sshll.u32 %s309_s9, 4  ;;  %s3091_s11 = int_to_ptr.vmem [resolvable:$true] %s1992_s11 }
 0x4c1   : > { %1637 = vrot.lane.b32.xlu0 %v2944_v47, %s2669_s8 }
 0x4f3   : > { %v779_v14 = vpop.xlane.xlu1 %778 }
 0x4f4   : > { %2459 = vrcp.f32 %v779_v14 }
 0x4f7   : > { %v950_v15 = vpop.xlane.xlu0 %949 }
 0x4f8   : > { %2461 = vrcp.f32 %v950_v15 }
 0x4fb   : > { %v1121_v16 = vpop.xlane.xlu1 %1120 }
 0x4fc   : > { %2463 = vrcp.f32 %v1121_v16 }
 0x4fe   : > { %v2460_v17 = vpop.eup %2459 }
 0x4ff   : > { %v781_v18 = vmul.f32 %v2460_v17, %v3015_v44  ;;  %v1292_v19 = vpop.xlane.xlu0 %1291  ;;  %v1467_v27 = vpop.permute.xlu1 %1466 }
 0x500   : > { %2465 = vrcp.f32 %v1292_v19 }
 0x501   : > { %2226 = vmatmul.mubr.msk.f32.vlgmr.msra.gmra.mrb[6].mxu1 %vm604_vm3, %v781_v18 }
 0x502   : > { %v2462_v20 = vpop.eup %2461  ;;  %2234 = vmatpush3.msra.mxu1 %v954_v11  ;;  %2235 = vmatprep.mubr.msk.f32.mxu1 %vm2654_vm1, %v2655_v24 }
 0x503   : > { %v952_v47 = vmul.f32 %v2462_v20, %v3019_v49  ;;  %2243 = vmatprep.subr.mxu1 %v2655_v24  ;;  %v1891_v49 = vld [vmem:[#allocation8] sm:$0xff] }
 0x504   : > { %v2312_v51 = vpack.c.bf16 %v1892_v50, %v1891_v49 }
 0x505   : > { %2236 = vmatmul.mubr.msk.f32.vlgmr.msra.gmra.mrb[8].mxu1 %vm604_vm3, %v952_v47 }
 0x506   : > { %v2464_v22 = vpop.eup %2463  ;;  %2244 = vmatpush3.msra.mxu1 %v1125_v12  ;;  %2245 = vmatprep.mubr.msk.f32.mxu1 %vm2654_vm1, %v2655_v24 }
 0x507   : > { %v1123_v23 = vmul.f32 %v2464_v22, %v2448_v54  ;;  %2253 = vmatprep.subr.mxu1 %v2655_v24  ;;  %v1634_v28 = vpop.xlane.xlu0 %1633  ;;  %2313 = vmatpush3.bf16.msra.mxu0 %v2312_v51  ;;  %v2315_v54 = vpack.c.bf16 %v1894_v53, %v1893_v52 }
 0x508   : > { %2314 = vmatprep.subr.bf16.mxu0 %v2653_v21 }
 0x509   : > { %2246 = vmatmul.mubr.msk.f32.vlgmr.msra.gmra.mrb[10].mxu1 %vm604_vm3, %v1123_v23 }
 0x50a   : > { %v2466_v25 = vpop.eup %2465  ;;  %2254 = vmatpush3.msra.mxu1 %v1296_v13  ;;  %2255 = vmatprep.mubr.msk.f32.mxu1 %vm2654_vm1, %v2655_v24 }
 0x50b   : > { %v1294_v26 = vmul.f32 %v2466_v25, %v3025_v57  ;;  %2263 = vmatprep.subr.mxu1 %v2655_v24  ;;  %2316 = vmatpush3.bf16.msra.mxu0 %v2315_v54 }
 0x50d   : > { %2256 = vmatmul.mubr.msk.f32.vlgmr.msra.gmra.mrb[12].mxu1 %vm604_vm3, %v1294_v26 }
 0x50e   : > { %2264 = vmatpush3.msra.mxu1 %v1467_v27  ;;  %2265 = vmatprep.mubr.msk.f32.mxu1 %vm2654_vm1, %v2655_v24 }
 0x50f   : > { %2273 = vmatprep.subr.mxu1 %v2655_v24 }
 0x530   : > { %v1463_v29 = vpop.xlane.xlu1 %1462 }
 0x531   : > { %2467 = vrcp.f32 %v1463_v29 }
 0x532   : > { %2469 = vrcp.f32 %v1634_v28 }
 0x534   : > { %v1809_v36 = vpop.permute.xlu1 %1808 }
 0x538   : > { %v1805_v30 = vpop.xlane.xlu0 %1804 }
 0x539   : > { %2471 = vrcp.f32 %v1805_v30 }
 0x53b   : > { %v2468_v31 = vpop.eup %2467 }
 0x53c   : > { %v1465_v32 = vmul.f32 %v2468_v31, %v2456_v7  ;;  %v1638_v33 = vpop.permute.xlu0 %1637  ;;  %v2470_v34 = vpop.eup %2469 }
 0x53d   : > { %v1636_v35 = vmul.f32 %v2470_v34, %v3029_v59 }
 0x53e   : > { %2266 = vmatmul.mubr.msk.f32.vlgmr.msra.gmra.mrb[14].mxu1 %vm604_vm3, %v1465_v32 }
 0x53f   : > { %2274 = vmatpush3.msra.mxu1 %v1638_v33  ;;  %2275 = vmatprep.mubr.msk.f32.mxu1 %vm2654_vm1, %v2655_v24 }
 0x540   : > { %2283 = vmatprep.subr.mxu1 %v2655_v24 }
 0x542   : > { %2276 = vmatmul.mubr.msk.f32.vlgmr.msra.gmra.mrb[16].mxu1 %vm604_vm3, %v1636_v35 }
 0x543   : > { %v2472_v37 = vpop.eup %2471  ;;  %2284 = vmatpush3.msra.mxu1 %v1809_v36  ;;  %2285 = vmatprep.mubr.msk.f32.mxu1 %vm2654_vm1, %v2655_v24 }
 0x544   : > { %v1807_v38 = vmul.f32 %v2472_v37, %v3041_v9 }
 0x546   : > { %2286 = vmatmul.mubr.msk.f32.vlgmr.msra.gmra.mrb[18].mxu1 %vm604_vm3, %v1807_v38 }
 0x561   : > { %v688_v39 = vpop.f32.mrb[4].mxu1 }
 0x562   : > { %692 = vst.msk [vmem:[#allocation2] sm:$0xff] %vm527_vm2, %v688_v39  ;;  %v2217_v40 = vpop.f32.mrb[5].mxu1 }
 0x5d4   : > { %v854_v41 = vpop.f32.mrb[6].mxu1 }
 0x5d5   : > { %859 = vrot.lane.b32.xlu0 %v854_v41, %s2670_s15  ;;  %v2227_v42 = vpop.f32.mrb[7].mxu1 }
 0x5d8   : > { %v1025_v43 = vpop.f32.mrb[8].mxu1 }
 0x5d9   : > { %1030 = vrot.lane.b32.xlu1 %v1025_v43, %s2671_s19  ;;  %v2237_v44 = vpop.f32.mrb[9].mxu1  ;;  %s3089_s19 = scalar_lea.hbm %s3145_s6, %s2136_s28 }
 0x5dc   : > { %v1196_v45 = vpop.f32.mrb[10].mxu1 }
 0x5dd   : > { %1201 = vrot.lane.b32.xlu0 %v1196_v45, %s2672_s30  ;;  %v2247_v24 = vpop.f32.mrb[11].mxu1  ;;  %s2559_s30 = scalar_lea.vmem %s3091_s11, 128 }
 0x5de   : > { %p2560_p8 = scmp.ne.s32.totalorder %s3091_s11, %s2559_s30 }
 0x5e0   : > { %v1367_v46 = vpop.f32.mrb[12].mxu1  ;;  %p2561_p1 = pnand %p2560_p8, %p3162_p12 }
 0x5e1   : > { %1372 = vrot.lane.b32.xlu1 %v1367_v46, %s2673_s18  ;;  %v2257_v48 = vpop.f32.mrb[13].mxu1  ;;  %s2563_s18 = sshll.u32 %s2677_s10, 4  ;;  %s2564_s18 = int_to_ptr.vmem [resolvable:$false] %s2563_s18 }
 0x5e2   : > { %p2562_p10 = pneg %p2561_p1  ;;  %p2566_p3 = scmp.lt.s32.totalorder %s3091_s11, %s2564_s18 }
 0x611   : > { %v1538_v55 = vpop.f32.mrb[14].mxu1 }
 0x612   : > { %1543 = vrot.lane.b32.xlu0 %v1538_v55, %s2674_s14  ;;  %v2267_v56 = vpop.f32.mrb[15].mxu1  ;;  %s2565_s14 = scalar_lea.vmem %s2564_s18, 256 }
 0x613   : > { %p2567_p5 = scmp.lt.s32.totalorder %s2565_s14, %s2559_s30 }
 0x615   : > { %v1709_v57 = vpop.f32.mrb[16].mxu1  ;;  %p2568_p9 = por %p2567_p5, %p2566_p3 }
 0x616   : > { %1714 = vrot.lane.b32.xlu1 %v1709_v57, %s2675_s20  ;;  %v2277_v58 = vpop.f32.mrb[17].mxu1 }
 0x617   : > { %p2569_p11 = pnand %p2568_p9, %p2562_p10 }
 0x619   : > { %v1880_v59 = vpop.f32.mrb[18].mxu1 }
 0x61a   : > { %1885 = vrot.lane.b32.xlu0 %v1880_v59, %s2676_s27  ;;  %v2287_v60 = vpop.f32.mrb[19].mxu1 }
 0x647   : > { %v860_v61 = vpop.permute.xlu0 %859 }
 0x648   : > { %863 = vst.msk [vmem:[#allocation2] sm:$0xff] %vm862_vm4, %v860_v61 }
 0x64b   : > { %v1031_v62 = vpop.permute.xlu1 %1030 }
 0x64c   : > { %1034 = vst.msk [vmem:[#allocation2] sm:$0xff] %vm1033_vm5, %v1031_v62 }
 0x64f   : > { %v1202_v21 = vpop.permute.xlu0 %1201 }
 0x650   : > { %1205 = vst.msk [vmem:[#allocation2] sm:$0xff] %vm1204_vm6, %v1202_v21 }
 0x653   : > { %v1373_v63 = vpop.permute.xlu1 %1372 }
 0x654   : > { %1376 = vst.msk [vmem:[#allocation2] sm:$0xff] %vm1375_vm7, %v1373_v63 }
 0x684   : > { %v1544_v1 = vpop.permute.xlu0 %1543 }
 0x685   : > { %1547 = vst.msk [vmem:[#allocation2] sm:$0xff] %vm1546_vm8, %v1544_v1 }
 0x688   : > { %v1715_v2 = vpop.permute.xlu1 %1714 }
 0x689   : > { %1718 = vst.msk [vmem:[#allocation2] sm:$0xff] %vm1717_vm9, %v1715_v2 }
 0x68c   : > { %v1886_v3 = vpop.permute.xlu0 %1885 }
 0x68d   : > { %1889 = vst.msk [vmem:[#allocation2] sm:$0xff] %vm1888_vm10, %v1886_v3 }
 0x694   : > { %v1890_v4 = vld [vmem:[#allocation2] sm:$0xff] }
 0x695   : > { %2297 = vmatmul.mubr.msk.f32.vlgmr.msra.gmra.mrb[16].mxu0 %vm318_vm0, %v1890_v4 }
 0x768   : > { %v1971_v6 = vpop.f32.mrb[16].mxu0 }
 0x769   : > { %v1972_v7 = vadd.f32 %v2133_v5, %v1971_v6  ;;  %v2298_v8 = vpop.f32.mrb[17].mxu0 }
 0x76b   : > { %v1975_v9 = vadd.f32 %v1972_v7, %v2912_v0 }
 0x76d   : > { %1976 = vst.msk [vmem:[%s309_s9] sm:$0xff] %vm318_vm0, %v1975_v9 }
 0x76e   : > { %2572 = shalt.err (!%p2569_p11)
}
 0x76f   : > { %s2573_s17 = scalar_lea.hbm %s3089_s19, 128  ;;  %s2577_s29 = scalar_lea.hbm %s3145_s6, 256 }
 0x770   : > { %p2574_p0 = scmp.ne.s32.totalorder %s3089_s19, %s2573_s17  ;;  %p2578_p6 = scmp.lt.u32.totalorder %s3089_s19, %s3145_s6 }
 0x771   : > { %p2579_p7 = scmp.lt.u32.totalorder %s2577_s29, %s2573_s17  ;;  %p2581_p8 = scmp.lt.u32.totalorder %s2573_s17, %s3089_s19 }
 0x772   : > { %p2575_p4 = pnand %p2574_p0, %p3162_p12 }
 0x773   : > { %p2580_p2 = por %p2579_p7, %p2578_p6 }
 0x774   : > { %p2576_p13 = pneg %p2575_p4 }
 0x775   : > { %p2582_p1 = por %p2581_p8, %p2580_p2 }
 0x777   : > { %p2583_p10 = pnand %p2582_p1, %p2576_p13 }
 0x779   : > { %2586 = shalt.err (!%p2583_p10)
}
 0x77a   : > { %2327 = dma.vmem_to_hbm [thread:$0]  (%p3162_p12), %s3091_s11, 128, %s3089_s19, %s1978_s24  }
 0x77b PF: > { %s3163_s9 = sld [smem:[#allocation13_spill]]  ;;  %s2004_s8 = sand.u32 1, %s2625_s21  }
 0x77c   : > { %p3165_p5 = scmp.ge.s32.totalorder %s2645_s26, 2  ;;  %s2005_s15 = scalar_lea.sflag [#allocation5], %s2004_s8 }
 0x781   : > { %p3164_p3 = scmp.ne.s32.totalorder %s3163_s9, 0 }
 0x783   : > { %p2341_p9 = pnand %p3165_p5, %p3164_p3 }
 0x785   : > { %2620 = dma.done.wait (!%p2341_p9), %s2005_s15, 128  }
 0x786   : > { %2622 = vsyncadd (!%p2341_p9), %s2005_s15, 4294967168  ;;  %s23_s26 = sadd.s32 1, %s2645_s26   ;;  %s3166_s21 = smov %s2629_s22 }
 0x787   : > { %p20_p11 = scmp.ge.s32.totalorder %s23_s26, 4   ;;  %s3167_s22 = smov %s2633_s23 }
 0x788   : > { %s3168_s23 = smov %s2855_s13  ;;  %s3169_s24 = smov %s2641_s25 }
 0x789   : > { %s3170_s25 = smov %s3172_s16  ;;  %22 = sbr.rel (!%p20_p11) target bundleno = 7 (0x7), region = 98 }
 0x790   :  { %2010 = vsyncpa [#allocation4], 1 }
 0x791   :  { %2012 = vsyncpa [#allocation4 + $0x1], 1 }
 0x792   :  { %2013 = vsyncpa [#allocation7], 1 }
 0x793   :  { %2014 = vsyncpa [#allocation5], 1 }
 0x794   :  { %2016 = vsyncpa [#allocation5 + $0x1], 1 }

</bundles_post_ra>
